<compile_context>
chip_gen: v6e
topology: v6e:2x2x1
jax: 0.10.0
libtpu: 0.0.40
codegen_flags: <defaults>
</compile_context>

<pallas_src>
import math
from functools import partial

import jax
import jax.numpy as jnp
from jax.experimental import pallas as pl
from jax.experimental.pallas import tpu as pltpu


def _attention_kernel(x_ref, w_ref, b_ref, mask_ref, out_ref, k_scr, v_scr,
                      *, num_heads, head_dim, q_block):
    """Grid = (batch, query_tile).

    x_ref   : (1, S, H)   hidden states (full sequence; re-DMA'd only when b changes)
    w_ref   : (H, 3H)     fused QKV weight ([in, out]); Q columns pre-scaled by 1/sqrt(D)
    b_ref   : (1, 3H)     fused QKV bias (f32; Q part pre-scaled)
    mask_ref: (1, 1, S)   additive attention mask (f32)
    out_ref : (1, TQ, H)  context output tile
    k/v_scr : (nh, S, D)  VMEM scratch, persistent across q-tiles of one batch
    """
    H = num_heads * head_dim
    D = head_dim
    qi = pl.program_id(1)

    # --- K/V projection, once per batch element (qi == 0). Full-width MXU dots;
    #     head split is a 2-D lane-window slice (no 3-D reshape/transpose).
    @pl.when(qi == 0)
    def _project_kv():
        x = x_ref[0]                                                   # [S, H]
        k_full = (jnp.dot(x, w_ref[:, H:2 * H],
                          preferred_element_type=jnp.float32)
                  + b_ref[:, H:2 * H]).astype(k_scr.dtype)             # [S, H]
        v_full = (jnp.dot(x, w_ref[:, 2 * H:3 * H],
                          preferred_element_type=jnp.float32)
                  + b_ref[:, 2 * H:3 * H]).astype(v_scr.dtype)         # [S, H]
        for h in range(num_heads):                                     # static unroll
            k_scr[h] = k_full[:, h * D:(h + 1) * D]
            v_scr[h] = v_full[:, h * D:(h + 1) * D]

    # --- Q projection for this query tile only (1/sqrt(D) folded into weights).
    qs = pl.multiple_of(qi * q_block, q_block)
    x_q = x_ref[0, pl.ds(qs, q_block), :]                              # [TQ, H]
    q_full = (jnp.dot(x_q, w_ref[:, :H],
                      preferred_element_type=jnp.float32)
              + b_ref[:, :H]).astype(k_scr.dtype)                      # [TQ, H]
    q_heads = jnp.stack([q_full[:, h * D:(h + 1) * D]
                         for h in range(num_heads)], axis=0)           # [nh, TQ, D]

    k_h = k_scr[...]                                                   # [nh, S, D]
    v_h = v_scr[...]                                                   # [nh, S, D]

    # scores = (Q/sqrt(D)) @ K^T + mask   (contraction on last axes; no .T)
    scores = jnp.einsum("hqd,hkd->hqk", q_heads, k_h,
                        preferred_element_type=jnp.float32)            # [nh, TQ, S]
    scores = scores + mask_ref[0]                                      # (1,S) broadcast

    # Numerically-stable softmax over keys; normalization deferred past P@V.
    m = jnp.max(scores, axis=-1, keepdims=True)
    p = jnp.exp(scores - m)                                            # f32 (EUP)
    denom = jnp.sum(p, axis=-1, keepdims=True)
    inv = pl.reciprocal(denom, approx=True)                            # EUP slot
    inv = inv * (2.0 - denom * inv)                                    # Newton -> f32 exact

    # context = P @ V (f32 accumulation), then normalize on [nh,TQ,D] (S/D x fewer elems).
    ctx = jnp.einsum("hqk,hkd->hqd", p.astype(v_h.dtype), v_h,
                     preferred_element_type=jnp.float32)               # [nh, TQ, D]
    ctx = ctx * inv

    # Lane-concat per-head slabs -> single lane-dense full-width [TQ, H] store.
    out_ref[0] = jnp.concatenate([ctx[h] for h in range(num_heads)],
                                 axis=-1).astype(out_ref.dtype)


def _vmem_limit_bytes():
    """Generation-aware scoped-VMEM limit (~75% of physical), or None if unknown."""
    try:
        return int(pltpu.get_tpu_info().vmem_capacity_bytes) * 3 // 4
    except Exception:
        return None


def splinter_self_attention(hidden_states, params, attention_mask, *,
                            num_heads, q_block=None,
                            compute_dtype=jnp.bfloat16):
    """hidden_states: [B, S, H]; attention_mask: additive mask [B, 1, S]."""
    B, S, H = hidden_states.shape
    assert H % num_heads == 0
    head_dim = H // num_heads
    out_dtype = hidden_states.dtype

    # Fuse Q/K/V projections into one [H, 3H] weight / [1, 3H] bias, folding
    # 1/sqrt(head_dim) into the Q columns. MXU operands go to compute_dtype
    # (bf16 by default); bias stays f32 (added to the f32 accumulator).
    scale = 1.0 / math.sqrt(head_dim)
    w_qkv = jnp.concatenate([params["wq"] * scale, params["wk"], params["wv"]],
                            axis=1).astype(compute_dtype)
    b_qkv = jnp.concatenate([params["bq"] * scale, params["bk"], params["bv"]]
                            ).reshape(1, 3 * H).astype(jnp.float32)
    x = hidden_states.astype(compute_dtype)
    mask = attention_mask.astype(jnp.float32)

    cds = jnp.dtype(compute_dtype).itemsize
    ods = jnp.dtype(out_dtype).itemsize

    vmem_limit = _vmem_limit_bytes()
    budget = vmem_limit if vmem_limit is not None else 32 * 1024 * 1024

    # Query-tile size: prefer 256 (v6e/v7x 256-wide MXU) when the VMEM budget
    # allows, else 128 when it divides S, else full S. Block shapes then always
    # satisfy the (8,128)-or-full-dim lowering rule.
    if q_block is None:
        fixed = (2 * 3 * H * H * cds            # fused QKV weight (<= 2 pipeline bufs)
                 + 2 * 3 * H * 4                # fused bias
                 + 2 * S * H * cds              # hidden-states block (double buffered)
                 + 2 * S * H * cds              # K + V scratch (nh*S*D each)
                 + 2 * 2 * S * 4)               # mask block

        def est(tq):
            return (fixed
                    + 2 * num_heads * tq * S * 4            # scores / exp(p) (f32)
                    + num_heads * tq * head_dim * (cds + 4)  # q_heads + ctx
                    + tq * H * (4 + cds)                     # q_full temporaries
                    + 2 * tq * H * ods)                      # output block

        if S % 256 == 0 and est(256) <= int(0.8 * budget):
            q_block = 256
        elif S % 128 == 0:
            q_block = 128
        else:
            q_block = S
    assert S % q_block == 0
    n_qt = S // q_block

    kernel = partial(_attention_kernel, num_heads=num_heads,
                     head_dim=head_dim, q_block=q_block)

    flops = 2 * B * S * H * (3 * H) + 4 * B * num_heads * S * S * head_dim
    transcendentals = B * num_heads * S * S
    bytes_accessed = int(cds * (hidden_states.size + w_qkv.size)
                         + 4 * (b_qkv.size + attention_mask.size)
                         + ods * B * S * H)
    cost = pl.CostEstimate(flops=int(flops),
                           transcendentals=int(transcendentals),
                           bytes_accessed=bytes_accessed)

    cp_kwargs = dict(
        # Batch axis parallel (megacore); q-tile axis stays sequential because
        # K/V scratch is filled at q-tile 0 of each batch and reused.
        dimension_semantics=("parallel", "arbitrary"),
    )
    if vmem_limit is not None:
        cp_kwargs["vmem_limit_bytes"] = vmem_limit
    compiler_params = pltpu.CompilerParams(**cp_kwargs)

    def _call(single_buffer_weights):
        # Grid-invariant weight/bias: single-buffer them (index_map always (0,0),
        # so default double buffering wastes a full weight-sized VMEM buffer).
        extra = ({"pipeline_mode": pl.Buffered(1)}
                 if single_buffer_weights else {})
        in_specs = [
            # Full-sequence hidden states; block index constant in the q-tile
            # axis, so the DMA only re-runs when the batch changes.
            pl.BlockSpec((1, S, H), lambda b, q: (b, 0, 0)),
            pl.BlockSpec((H, 3 * H), lambda b, q: (0, 0), **extra),
            pl.BlockSpec((1, 3 * H), lambda b, q: (0, 0), **extra),
            pl.BlockSpec((1, 1, S), lambda b, q: (b, 0, 0)),
        ]
        fn = pl.pallas_call(
            kernel,
            out_shape=jax.ShapeDtypeStruct((B, S, H), out_dtype),
            grid_spec=pltpu.PrefetchScalarGridSpec(
                num_scalar_prefetch=0,
                grid=(B, n_qt),
                in_specs=in_specs,
                out_specs=pl.BlockSpec((1, q_block, H), lambda b, q: (b, q, 0)),
                scratch_shapes=[
                    pltpu.VMEM((num_heads, S, head_dim), compute_dtype),   # K
                    pltpu.VMEM((num_heads, S, head_dim), compute_dtype),   # V
                ],
            ),
            compiler_params=compiler_params,
            cost_estimate=cost,
        )
        return fn(x, w_qkv, b_qkv, mask)

    try:
        return _call(True)
    except Exception:
        # pipeline_mode=pl.Buffered(1) not supported by this JAX/Mosaic build;
        # fall back to default double-buffered weights (identical semantics).
        return _call(False)


def _reference(hidden_states, params, attention_mask, *, num_heads):
    """Pure-JAX f32 reference mirroring the PyTorch forward."""
    B, S, H = hidden_states.shape
    D = H // num_heads

    def proj(w, b):
        y = jnp.einsum("bsh,ho->bso", hidden_states, w) + b
        return y.reshape(B, S, num_heads, D).transpose(0, 2, 1, 3)  # [B,nh,S,D]

    q = proj(params["wq"], params["bq"])
    k = proj(params["wk"], params["bk"])
    v = proj(params["wv"], params["bv"])

    scores = jnp.einsum("bhqd,bhkd->bhqk", q, k) / math.sqrt(D)
    scores = scores + attention_mask[:, None, :, :]
    probs = jax.nn.softmax(scores, axis=-1)
    ctx = jnp.einsum("bhqk,bhkd->bhqd", probs, v)
    return ctx.transpose(0, 2, 1, 3).reshape(B, S, H)


if __name__ == "__main__":
    # Small config: hidden_size=32, num_attention_heads=4, seq=8, batch=2.
    B, S, H = 2, 8, 32
    NUM_HEADS = 4

    key = jax.random.PRNGKey(0)
    keys = jax.random.split(key, 8)

    hidden_states = jax.random.normal(keys[0], (B, S, H), dtype=jnp.float32)

    params = {
        "wq": jax.random.normal(keys[1], (H, H), dtype=jnp.float32) * 0.05,
        "bq": jax.random.normal(keys[2], (H,), dtype=jnp.float32) * 0.01,
        "wk": jax.random.normal(keys[3], (H, H), dtype=jnp.float32) * 0.05,
        "bk": jax.random.normal(keys[4], (H,), dtype=jnp.float32) * 0.01,
        "wv": jax.random.normal(keys[5], (H, H), dtype=jnp.float32) * 0.05,
        "bv": jax.random.normal(keys[6], (H,), dtype=jnp.float32) * 0.01,
    }

    # Additive attention mask [B, 1, S]: mask out the last two key positions of
    # batch element 1 (value -1e9), everything else visible (0.0).
    attention_mask = jnp.zeros((B, 1, S), dtype=jnp.float32).at[1, 0, -2:].set(-1e9)

    ref = _reference(hidden_states, params, attention_mask, num_heads=NUM_HEADS)

    # f32 compute path: tight check against the HF-style reference.
    out_f32 = splinter_self_attention(hidden_states, params, attention_mask,
                                      num_heads=NUM_HEADS,
                                      compute_dtype=jnp.float32)
    out_f32 = jax.block_until_ready(out_f32)
    assert out_f32.shape == (B, S, H)
    assert jnp.allclose(out_f32, ref, atol=1e-4, rtol=1e-4), (
        f"f32 max abs err {jnp.max(jnp.abs(out_f32 - ref))}")

    # bf16 MXU path (the default / performance configuration): loose tolerance.
    out_bf16 = splinter_self_attention(hidden_states, params, attention_mask,
                                       num_heads=NUM_HEADS)
    out_bf16 = jax.block_until_ready(out_bf16)
    assert out_bf16.shape == (B, S, H)
    assert jnp.allclose(out_bf16, ref, atol=3e-2, rtol=3e-2), (
        f"bf16 max abs err {jnp.max(jnp.abs(out_bf16 - ref))}")

    print("KERNEL_OK")
</pallas_src>

<mosaic_0001>
module attributes {stable_mosaic.version = 11 : i64} {
  func.func @_attention_kernel(%arg0: i32, %arg1: i32, %arg2: memref<1x8x32xf32, #tpu.memory_space<vmem>>, %arg3: memref<32x96xf32, #tpu.memory_space<vmem>>, %arg4: memref<1x96xf32, #tpu.memory_space<vmem>>, %arg5: memref<1x1x8xf32, #tpu.memory_space<vmem>>, %arg6: memref<1x8x32xf32, #tpu.memory_space<vmem>>, %arg7: memref<4x8x8xf32, #tpu.memory_space<vmem>>, %arg8: memref<4x8x8xf32, #tpu.memory_space<vmem>>) attributes {dimension_semantics = [#tpu.dimension_semantics<parallel>, #tpu.dimension_semantics<arbitrary>], iteration_bounds = array<i64: 2, 1>, scalar_prefetch = 0 : i64, scratch_operands = 2 : i64, tpu.core_type = #tpu.core_type<tc>, window_params = [{transform_indices = @transform_0, window_bounds = array<i64: 1, 8, 32>}, {pipeline_mode = #tpu.pipeline_mode<synchronous>, transform_indices = @transform_1, window_bounds = array<i64: 32, 96>}, {pipeline_mode = #tpu.pipeline_mode<synchronous>, transform_indices = @transform_2, window_bounds = array<i64: 1, 96>}, {transform_indices = @transform_3, window_bounds = array<i64: 1, 1, 8>}, {transform_indices = @transform_4, window_bounds = array<i64: 1, 8, 32>}]} {
    %c0_i32 = arith.constant 0 : i32
    %0 = arith.cmpi eq, %arg1, %c0_i32 : i32
    %1 = arith.extui %0 : i1 to i32
    %c0_i32_0 = arith.constant 0 : i32
    %2 = arith.cmpi ne, %1, %c0_i32_0 : i32
    scf.if %2 {
      %c0_23 = arith.constant 0 : index
      %c0_24 = arith.constant 0 : index
      %c0_25 = arith.constant 0 : index
      %57 = vector.load %arg2[%c0_23, %c0_24, %c0_25] : memref<1x8x32xf32, #tpu.memory_space<vmem>>, vector<1x8x32xf32>
      %58 = vector.shape_cast %57 : vector<1x8x32xf32> to vector<8x32xf32>
      %c0_26 = arith.constant 0 : index
      %c32 = arith.constant 32 : index
      %59 = vector.load %arg3[%c0_26, %c32] : memref<32x96xf32, #tpu.memory_space<vmem>>, vector<32x32xf32>
      %cst_27 = arith.constant dense<0.000000e+00> : vector<8x32xf32>
      %60 = tpu.matmul %58, %59, %cst_27 {dimension_numbers = #tpu.dot_dimension_numbers<[1], [0], [0], [1], [0, 0, 1, 1], [], []>} : vector<8x32xf32>, vector<32x32xf32>, vector<8x32xf32> -> vector<8x32xf32>
      %c0_28 = arith.constant 0 : index
      %c32_29 = arith.constant 32 : index
      %61 = vector.load %arg4[%c0_28, %c32_29] : memref<1x96xf32, #tpu.memory_space<vmem>>, vector<1x32xf32>
      %62 = vector.broadcast %61 : vector<1x32xf32> to vector<8x32xf32>
      %63 = arith.addf %60, %62 : vector<8x32xf32>
      %c0_30 = arith.constant 0 : index
      %c64 = arith.constant 64 : index
      %64 = vector.load %arg3[%c0_30, %c64] : memref<32x96xf32, #tpu.memory_space<vmem>>, vector<32x32xf32>
      %cst_31 = arith.constant dense<0.000000e+00> : vector<8x32xf32>
      %65 = tpu.matmul %58, %64, %cst_31 {dimension_numbers = #tpu.dot_dimension_numbers<[1], [0], [0], [1], [0, 0, 1, 1], [], []>} : vector<8x32xf32>, vector<32x32xf32>, vector<8x32xf32> -> vector<8x32xf32>
      %c0_32 = arith.constant 0 : index
      %c64_33 = arith.constant 64 : index
      %66 = vector.load %arg4[%c0_32, %c64_33] : memref<1x96xf32, #tpu.memory_space<vmem>>, vector<1x32xf32>
      %67 = vector.broadcast %66 : vector<1x32xf32> to vector<8x32xf32>
      %68 = arith.addf %65, %67 : vector<8x32xf32>
      %69 = vector.extract_strided_slice %63 {offsets = [0, 0], sizes = [8, 8], strides = [1, 1]} : vector<8x32xf32> to vector<8x8xf32>
      %c0_34 = arith.constant 0 : index
      %c0_35 = arith.constant 0 : index
      %c0_36 = arith.constant 0 : index
      %70 = vector.load %arg7[%c0_34, %c0_35, %c0_36] : memref<4x8x8xf32, #tpu.memory_space<vmem>>, vector<1x8x8xf32>
      %71 = vector.shape_cast %70 : vector<1x8x8xf32> to vector<8x8xf32>
      %72 = vector.shape_cast %69 : vector<8x8xf32> to vector<1x8x8xf32>
      tpu.vector_store %arg7[%c0_34, %c0_35, %c0_36], %72 {strides = array<i32>} : memref<4x8x8xf32, #tpu.memory_space<vmem>>, vector<1x8x8xf32>,
      %73 = vector.extract_strided_slice %68 {offsets = [0, 0], sizes = [8, 8], strides = [1, 1]} : vector<8x32xf32> to vector<8x8xf32>
      %c0_37 = arith.constant 0 : index
      %c0_38 = arith.constant 0 : index
      %c0_39 = arith.constant 0 : index
      %74 = vector.load %arg8[%c0_37, %c0_38, %c0_39] : memref<4x8x8xf32, #tpu.memory_space<vmem>>, vector<1x8x8xf32>
      %75 = vector.shape_cast %74 : vector<1x8x8xf32> to vector<8x8xf32>
      %76 = vector.shape_cast %73 : vector<8x8xf32> to vector<1x8x8xf32>
      tpu.vector_store %arg8[%c0_37, %c0_38, %c0_39], %76 {strides = array<i32>} : memref<4x8x8xf32, #tpu.memory_space<vmem>>, vector<1x8x8xf32>,
      %77 = vector.extract_strided_slice %63 {offsets = [0, 8], sizes = [8, 8], strides = [1, 1]} : vector<8x32xf32> to vector<8x8xf32>
      %c1 = arith.constant 1 : index
      %c0_40 = arith.constant 0 : index
      %c0_41 = arith.constant 0 : index
      %78 = vector.load %arg7[%c1, %c0_40, %c0_41] : memref<4x8x8xf32, #tpu.memory_space<vmem>>, vector<1x8x8xf32>
      %79 = vector.shape_cast %78 : vector<1x8x8xf32> to vector<8x8xf32>
      %80 = vector.shape_cast %77 : vector<8x8xf32> to vector<1x8x8xf32>
      tpu.vector_store %arg7[%c1, %c0_40, %c0_41], %80 {strides = array<i32>} : memref<4x8x8xf32, #tpu.memory_space<vmem>>, vector<1x8x8xf32>,
      %81 = vector.extract_strided_slice %68 {offsets = [0, 8], sizes = [8, 8], strides = [1, 1]} : vector<8x32xf32> to vector<8x8xf32>
      %c1_42 = arith.constant 1 : index
      %c0_43 = arith.constant 0 : index
      %c0_44 = arith.constant 0 : index
      %82 = vector.load %arg8[%c1_42, %c0_43, %c0_44] : memref<4x8x8xf32, #tpu.memory_space<vmem>>, vector<1x8x8xf32>
      %83 = vector.shape_cast %82 : vector<1x8x8xf32> to vector<8x8xf32>
      %84 = vector.shape_cast %81 : vector<8x8xf32> to vector<1x8x8xf32>
      tpu.vector_store %arg8[%c1_42, %c0_43, %c0_44], %84 {strides = array<i32>} : memref<4x8x8xf32, #tpu.memory_space<vmem>>, vector<1x8x8xf32>,
      %85 = vector.extract_strided_slice %63 {offsets = [0, 16], sizes = [8, 8], strides = [1, 1]} : vector<8x32xf32> to vector<8x8xf32>
      %c2 = arith.constant 2 : index
      %c0_45 = arith.constant 0 : index
      %c0_46 = arith.constant 0 : index
      %86 = vector.load %arg7[%c2, %c0_45, %c0_46] : memref<4x8x8xf32, #tpu.memory_space<vmem>>, vector<1x8x8xf32>
      %87 = vector.shape_cast %86 : vector<1x8x8xf32> to vector<8x8xf32>
      %88 = vector.shape_cast %85 : vector<8x8xf32> to vector<1x8x8xf32>
      tpu.vector_store %arg7[%c2, %c0_45, %c0_46], %88 {strides = array<i32>} : memref<4x8x8xf32, #tpu.memory_space<vmem>>, vector<1x8x8xf32>,
      %89 = vector.extract_strided_slice %68 {offsets = [0, 16], sizes = [8, 8], strides = [1, 1]} : vector<8x32xf32> to vector<8x8xf32>
      %c2_47 = arith.constant 2 : index
      %c0_48 = arith.constant 0 : index
      %c0_49 = arith.constant 0 : index
      %90 = vector.load %arg8[%c2_47, %c0_48, %c0_49] : memref<4x8x8xf32, #tpu.memory_space<vmem>>, vector<1x8x8xf32>
      %91 = vector.shape_cast %90 : vector<1x8x8xf32> to vector<8x8xf32>
      %92 = vector.shape_cast %89 : vector<8x8xf32> to vector<1x8x8xf32>
      tpu.vector_store %arg8[%c2_47, %c0_48, %c0_49], %92 {strides = array<i32>} : memref<4x8x8xf32, #tpu.memory_space<vmem>>, vector<1x8x8xf32>,
      %93 = vector.extract_strided_slice %63 {offsets = [0, 24], sizes = [8, 8], strides = [1, 1]} : vector<8x32xf32> to vector<8x8xf32>
      %c3 = arith.constant 3 : index
      %c0_50 = arith.constant 0 : index
      %c0_51 = arith.constant 0 : index
      %94 = vector.load %arg7[%c3, %c0_50, %c0_51] : memref<4x8x8xf32, #tpu.memory_space<vmem>>, vector<1x8x8xf32>
      %95 = vector.shape_cast %94 : vector<1x8x8xf32> to vector<8x8xf32>
      %96 = vector.shape_cast %93 : vector<8x8xf32> to vector<1x8x8xf32>
      tpu.vector_store %arg7[%c3, %c0_50, %c0_51], %96 {strides = array<i32>} : memref<4x8x8xf32, #tpu.memory_space<vmem>>, vector<1x8x8xf32>,
      %97 = vector.extract_strided_slice %68 {offsets = [0, 24], sizes = [8, 8], strides = [1, 1]} : vector<8x32xf32> to vector<8x8xf32>
      %c3_52 = arith.constant 3 : index
      %c0_53 = arith.constant 0 : index
      %c0_54 = arith.constant 0 : index
      %98 = vector.load %arg8[%c3_52, %c0_53, %c0_54] : memref<4x8x8xf32, #tpu.memory_space<vmem>>, vector<1x8x8xf32>
      %99 = vector.shape_cast %98 : vector<1x8x8xf32> to vector<8x8xf32>
      %100 = vector.shape_cast %97 : vector<8x8xf32> to vector<1x8x8xf32>
      tpu.vector_store %arg8[%c3_52, %c0_53, %c0_54], %100 {strides = array<i32>} : memref<4x8x8xf32, #tpu.memory_space<vmem>>, vector<1x8x8xf32>,
    } else {
    }
    %c8_i32 = arith.constant 8 : i32
    %3 = arith.muli %arg1, %c8_i32 : i32
    %4 = tpu.assume_multiple %3, 8 : i32
    %c0 = arith.constant 0 : index
    %5 = arith.index_cast %4 : i32 to index
    %c0_1 = arith.constant 0 : index
    %6 = vector.load %arg2[%c0, %5, %c0_1] : memref<1x8x32xf32, #tpu.memory_space<vmem>>, vector<1x8x32xf32>
    %7 = vector.shape_cast %6 : vector<1x8x32xf32> to vector<8x32xf32>
    %c0_2 = arith.constant 0 : index
    %c0_3 = arith.constant 0 : index
    %8 = vector.load %arg3[%c0_2, %c0_3] : memref<32x96xf32, #tpu.memory_space<vmem>>, vector<32x32xf32>
    %cst = arith.constant dense<0.000000e+00> : vector<8x32xf32>
    %9 = tpu.matmul %7, %8, %cst {dimension_numbers = #tpu.dot_dimension_numbers<[1], [0], [0], [1], [0, 0, 1, 1], [], []>} : vector<8x32xf32>, vector<32x32xf32>, vector<8x32xf32> -> vector<8x32xf32>
    %c0_4 = arith.constant 0 : index
    %c0_5 = arith.constant 0 : index
    %10 = vector.load %arg4[%c0_4, %c0_5] : memref<1x96xf32, #tpu.memory_space<vmem>>, vector<1x32xf32>
    %11 = vector.broadcast %10 : vector<1x32xf32> to vector<8x32xf32>
    %12 = arith.addf %9, %11 : vector<8x32xf32>
    %13 = vector.extract_strided_slice %12 {offsets = [0, 0], sizes = [8, 8], strides = [1, 1]} : vector<8x32xf32> to vector<8x8xf32>
    %14 = vector.extract_strided_slice %12 {offsets = [0, 8], sizes = [8, 8], strides = [1, 1]} : vector<8x32xf32> to vector<8x8xf32>
    %15 = vector.extract_strided_slice %12 {offsets = [0, 16], sizes = [8, 8], strides = [1, 1]} : vector<8x32xf32> to vector<8x8xf32>
    %16 = vector.extract_strided_slice %12 {offsets = [0, 24], sizes = [8, 8], strides = [1, 1]} : vector<8x32xf32> to vector<8x8xf32>
    %17 = vector.shape_cast %13 : vector<8x8xf32> to vector<1x8x8xf32>
    %18 = vector.shape_cast %14 : vector<8x8xf32> to vector<1x8x8xf32>
    %19 = vector.shape_cast %15 : vector<8x8xf32> to vector<1x8x8xf32>
    %20 = vector.shape_cast %16 : vector<8x8xf32> to vector<1x8x8xf32>
    %21 = tpu.concatenate %17, %18, %19, %20 in 0 : vector<1x8x8xf32>, vector<1x8x8xf32>, vector<1x8x8xf32>, vector<1x8x8xf32> -> vector<4x8x8xf32>
    %c0_6 = arith.constant 0 : index
    %c0_7 = arith.constant 0 : index
    %c0_8 = arith.constant 0 : index
    %22 = vector.load %arg7[%c0_6, %c0_7, %c0_8] : memref<4x8x8xf32, #tpu.memory_space<vmem>>, vector<4x8x8xf32>
    %c0_9 = arith.constant 0 : index
    %c0_10 = arith.constant 0 : index
    %c0_11 = arith.constant 0 : index
    %23 = vector.load %arg8[%c0_9, %c0_10, %c0_11] : memref<4x8x8xf32, #tpu.memory_space<vmem>>, vector<4x8x8xf32>
    "tpu.trace_start"() <{level = 10 : i32, message = "hqd,hkd->hqk"}> : () -> ()
    %cst_12 = arith.constant dense<0.000000e+00> : vector<4x8x8xf32>
    %24 = tpu.matmul %21, %22, %cst_12 {dimension_numbers = #tpu.dot_dimension_numbers<[2], [2], [1], [1], [0, 0, 0, 1, 1, 1], [0], [0]>} : vector<4x8x8xf32>, vector<4x8x8xf32>, vector<4x8x8xf32> -> vector<4x8x8xf32>
    "tpu.trace_stop"() : () -> ()
    %c0_13 = arith.constant 0 : index
    %c0_14 = arith.constant 0 : index
    %c0_15 = arith.constant 0 : index
    %25 = vector.load %arg5[%c0_13, %c0_14, %c0_15] : memref<1x1x8xf32, #tpu.memory_space<vmem>>, vector<1x1x8xf32>
    %26 = vector.shape_cast %25 : vector<1x1x8xf32> to vector<1x8xf32>
    %27 = vector.shape_cast %26 : vector<1x8xf32> to vector<1x1x8xf32>
    %28 = vector.broadcast %27 : vector<1x1x8xf32> to vector<4x8x8xf32>
    %29 = arith.addf %24, %28 : vector<4x8x8xf32>
    %cst_16 = arith.constant dense<0xFF800000> : vector<4x8xf32>
    %30 = vector.multi_reduction <maximumf>, %29, %cst_16 [2] : vector<4x8x8xf32> to vector<4x8xf32>
    %31 = vector.shape_cast %30 : vector<4x8xf32> to vector<4x8x1xf32>
    %32 = vector.broadcast %31 : vector<4x8x1xf32> to vector<4x8x8xf32>
    %33 = arith.subf %29, %32 : vector<4x8x8xf32>
    %34 = math.exp %33 : vector<4x8x8xf32>
    %cst_17 = arith.constant dense<0.000000e+00> : vector<4x8xf32>
    %35 = vector.multi_reduction <add>, %34, %cst_17 [2] : vector<4x8x8xf32> to vector<4x8xf32>
    %36 = vector.shape_cast %35 : vector<4x8xf32> to vector<4x8x1xf32>
    %37 = tpu.reciprocal %36 {approx = true} : vector<4x8x1xf32> -> vector<4x8x1xf32>
    %38 = arith.mulf %36, %37 : vector<4x8x1xf32>
    %cst_18 = arith.constant 2.000000e+00 : f32
    %39 = vector.broadcast %cst_18 : f32 to vector<4x8x1xf32>
    %40 = arith.subf %39, %38 : vector<4x8x1xf32>
    %41 = arith.mulf %37, %40 : vector<4x8x1xf32>
    "tpu.trace_start"() <{level = 10 : i32, message = "hqk,hkd->hqd"}> : () -> ()
    %cst_19 = arith.constant dense<0.000000e+00> : vector<4x8x8xf32>
    %42 = tpu.matmul %34, %23, %cst_19 {dimension_numbers = #tpu.dot_dimension_numbers<[2], [1], [1], [2], [0, 0, 0, 1, 1, 2], [0], [0]>} : vector<4x8x8xf32>, vector<4x8x8xf32>, vector<4x8x8xf32> -> vector<4x8x8xf32>
    "tpu.trace_stop"() : () -> ()
    %43 = vector.broadcast %41 : vector<4x8x1xf32> to vector<4x8x8xf32>
    %44 = arith.mulf %42, %43 : vector<4x8x8xf32>
    %45 = vector.extract_strided_slice %44 {offsets = [0, 0, 0], sizes = [1, 8, 8], strides = [1, 1, 1]} : vector<4x8x8xf32> to vector<1x8x8xf32>
    %46 = vector.shape_cast %45 : vector<1x8x8xf32> to vector<8x8xf32>
    %47 = vector.extract_strided_slice %44 {offsets = [1, 0, 0], sizes = [1, 8, 8], strides = [1, 1, 1]} : vector<4x8x8xf32> to vector<1x8x8xf32>
    %48 = vector.shape_cast %47 : vector<1x8x8xf32> to vector<8x8xf32>
    %49 = vector.extract_strided_slice %44 {offsets = [2, 0, 0], sizes = [1, 8, 8], strides = [1, 1, 1]} : vector<4x8x8xf32> to vector<1x8x8xf32>
    %50 = vector.shape_cast %49 : vector<1x8x8xf32> to vector<8x8xf32>
    %51 = vector.extract_strided_slice %44 {offsets = [3, 0, 0], sizes = [1, 8, 8], strides = [1, 1, 1]} : vector<4x8x8xf32> to vector<1x8x8xf32>
    %52 = vector.shape_cast %51 : vector<1x8x8xf32> to vector<8x8xf32>
    %53 = tpu.concatenate %46, %48, %50, %52 in 1 : vector<8x8xf32>, vector<8x8xf32>, vector<8x8xf32>, vector<8x8xf32> -> vector<8x32xf32>
    %c0_20 = arith.constant 0 : index
    %c0_21 = arith.constant 0 : index
    %c0_22 = arith.constant 0 : index
    %54 = vector.load %arg6[%c0_20, %c0_21, %c0_22] : memref<1x8x32xf32, #tpu.memory_space<vmem>>, vector<1x8x32xf32>
    %55 = vector.shape_cast %54 : vector<1x8x32xf32> to vector<8x32xf32>
    %56 = vector.shape_cast %53 : vector<8x32xf32> to vector<1x8x32xf32>
    tpu.vector_store %arg6[%c0_20, %c0_21, %c0_22], %56 {strides = array<i32>} : memref<1x8x32xf32, #tpu.memory_space<vmem>>, vector<1x8x32xf32>,
    return
  }
  func.func @transform_0(%arg0: i32, %arg1: i32) -> (i32, i32, i32) {
    %c0_i32 = arith.constant 0 : i32
    %c0_i32_0 = arith.constant 0 : i32
    %c0_i32_1 = arith.constant 0 : i32
    return %arg0, %c0_i32, %c0_i32_0 : i32, i32, i32
  }
  func.func @transform_1(%arg0: i32, %arg1: i32) -> (i32, i32) {
    %c0_i32 = arith.constant 0 : i32
    %c0_i32_0 = arith.constant 0 : i32
    %c0_i32_1 = arith.constant 0 : i32
    return %c0_i32, %c0_i32_0 : i32, i32
  }
  func.func @transform_2(%arg0: i32, %arg1: i32) -> (i32, i32) {
    %c0_i32 = arith.constant 0 : i32
    %c0_i32_0 = arith.constant 0 : i32
    %c0_i32_1 = arith.constant 0 : i32
    return %c0_i32, %c0_i32_0 : i32, i32
  }
  func.func @transform_3(%arg0: i32, %arg1: i32) -> (i32, i32, i32) {
    %c0_i32 = arith.constant 0 : i32
    %c0_i32_0 = arith.constant 0 : i32
    %c0_i32_1 = arith.constant 0 : i32
    return %arg0, %c0_i32, %c0_i32_0 : i32, i32, i32
  }
  func.func @transform_4(%arg0: i32, %arg1: i32) -> (i32, i32, i32) {
    %c0_i32 = arith.constant 0 : i32
    %c0_i32_0 = arith.constant 0 : i32
    return %arg0, %arg1, %c0_i32 : i32, i32, i32
  }
}

module attributes {stable_mosaic.version = 11 : i64} {
  func.func @_attention_kernel(%arg0: i32, %arg1: i32, %arg2: memref<1x8x32xf32, #tpu.memory_space<vmem>>, %arg3: memref<32x96xf32, #tpu.memory_space<vmem>>, %arg4: memref<1x96xf32, #tpu.memory_space<vmem>>, %arg5: memref<1x1x8xf32, #tpu.memory_space<vmem>>, %arg6: memref<1x8x32xf32, #tpu.memory_space<vmem>>, %arg7: memref<4x8x8xf32, #tpu.memory_space<vmem>>, %arg8: memref<4x8x8xf32, #tpu.memory_space<vmem>>) attributes {dimension_semantics = [#tpu.dimension_semantics<parallel>, #tpu.dimension_semantics<arbitrary>], iteration_bounds = array<i64: 2, 1>, scalar_prefetch = 0 : i64, scratch_operands = 2 : i64, tpu.core_type = #tpu.core_type<tc>, window_params = [{transform_indices = @transform_0, window_bounds = array<i64: 1, 8, 32>}, {pipeline_mode = #tpu.pipeline_mode<synchronous>, transform_indices = @transform_1, window_bounds = array<i64: 32, 96>}, {pipeline_mode = #tpu.pipeline_mode<synchronous>, transform_indices = @transform_2, window_bounds = array<i64: 1, 96>}, {transform_indices = @transform_3, window_bounds = array<i64: 1, 1, 8>}, {transform_indices = @transform_4, window_bounds = array<i64: 1, 8, 32>}]} {
    %c0_i32 = arith.constant 0 : i32
    %0 = arith.cmpi eq, %arg1, %c0_i32 : i32
    %1 = arith.extui %0 : i1 to i32
    %c0_i32_0 = arith.constant 0 : i32
    %2 = arith.cmpi ne, %1, %c0_i32_0 : i32
    scf.if %2 {
      %c0_23 = arith.constant 0 : index
      %c0_24 = arith.constant 0 : index
      %c0_25 = arith.constant 0 : index
      %57 = vector.load %arg2[%c0_23, %c0_24, %c0_25] : memref<1x8x32xf32, #tpu.memory_space<vmem>>, vector<1x8x32xf32>
      %58 = vector.shape_cast %57 : vector<1x8x32xf32> to vector<8x32xf32>
      %c0_26 = arith.constant 0 : index
      %c32 = arith.constant 32 : index
      %59 = vector.load %arg3[%c0_26, %c32] : memref<32x96xf32, #tpu.memory_space<vmem>>, vector<32x32xf32>
      %cst_27 = arith.constant dense<0.000000e+00> : vector<8x32xf32>
      %60 = tpu.matmul %58, %59, %cst_27 {dimension_numbers = #tpu.dot_dimension_numbers<[1], [0], [0], [1], [0, 0, 1, 1], [], []>} : vector<8x32xf32>, vector<32x32xf32>, vector<8x32xf32> -> vector<8x32xf32>
      %c0_28 = arith.constant 0 : index
      %c32_29 = arith.constant 32 : index
      %61 = vector.load %arg4[%c0_28, %c32_29] : memref<1x96xf32, #tpu.memory_space<vmem>>, vector<1x32xf32>
      %62 = vector.broadcast %61 : vector<1x32xf32> to vector<8x32xf32>
      %63 = arith.addf %60, %62 : vector<8x32xf32>
      %c0_30 = arith.constant 0 : index
      %c64 = arith.constant 64 : index
      %64 = vector.load %arg3[%c0_30, %c64] : memref<32x96xf32, #tpu.memory_space<vmem>>, vector<32x32xf32>
      %cst_31 = arith.constant dense<0.000000e+00> : vector<8x32xf32>
      %65 = tpu.matmul %58, %64, %cst_31 {dimension_numbers = #tpu.dot_dimension_numbers<[1], [0], [0], [1], [0, 0, 1, 1], [], []>} : vector<8x32xf32>, vector<32x32xf32>, vector<8x32xf32> -> vector<8x32xf32>
      %c0_32 = arith.constant 0 : index
      %c64_33 = arith.constant 64 : index
      %66 = vector.load %arg4[%c0_32, %c64_33] : memref<1x96xf32, #tpu.memory_space<vmem>>, vector<1x32xf32>
      %67 = vector.broadcast %66 : vector<1x32xf32> to vector<8x32xf32>
      %68 = arith.addf %65, %67 : vector<8x32xf32>
      %69 = vector.extract_strided_slice %63 {offsets = [0, 0], sizes = [8, 8], strides = [1, 1]} : vector<8x32xf32> to vector<8x8xf32>
      %c0_34 = arith.constant 0 : index
      %c0_35 = arith.constant 0 : index
      %c0_36 = arith.constant 0 : index
      %70 = vector.load %arg7[%c0_34, %c0_35, %c0_36] : memref<4x8x8xf32, #tpu.memory_space<vmem>>, vector<1x8x8xf32>
      %71 = vector.shape_cast %70 : vector<1x8x8xf32> to vector<8x8xf32>
      %72 = vector.shape_cast %69 : vector<8x8xf32> to vector<1x8x8xf32>
      tpu.vector_store %arg7[%c0_34, %c0_35, %c0_36], %72 {strides = array<i32>} : memref<4x8x8xf32, #tpu.memory_space<vmem>>, vector<1x8x8xf32>,
      %73 = vector.extract_strided_slice %68 {offsets = [0, 0], sizes = [8, 8], strides = [1, 1]} : vector<8x32xf32> to vector<8x8xf32>
      %c0_37 = arith.constant 0 : index
      %c0_38 = arith.constant 0 : index
      %c0_39 = arith.constant 0 : index
      %74 = vector.load %arg8[%c0_37, %c0_38, %c0_39] : memref<4x8x8xf32, #tpu.memory_space<vmem>>, vector<1x8x8xf32>
      %75 = vector.shape_cast %74 : vector<1x8x8xf32> to vector<8x8xf32>
      %76 = vector.shape_cast %73 : vector<8x8xf32> to vector<1x8x8xf32>
      tpu.vector_store %arg8[%c0_37, %c0_38, %c0_39], %76 {strides = array<i32>} : memref<4x8x8xf32, #tpu.memory_space<vmem>>, vector<1x8x8xf32>,
      %77 = vector.extract_strided_slice %63 {offsets = [0, 8], sizes = [8, 8], strides = [1, 1]} : vector<8x32xf32> to vector<8x8xf32>
      %c1 = arith.constant 1 : index
      %c0_40 = arith.constant 0 : index
      %c0_41 = arith.constant 0 : index
      %78 = vector.load %arg7[%c1, %c0_40, %c0_41] : memref<4x8x8xf32, #tpu.memory_space<vmem>>, vector<1x8x8xf32>
      %79 = vector.shape_cast %78 : vector<1x8x8xf32> to vector<8x8xf32>
      %80 = vector.shape_cast %77 : vector<8x8xf32> to vector<1x8x8xf32>
      tpu.vector_store %arg7[%c1, %c0_40, %c0_41], %80 {strides = array<i32>} : memref<4x8x8xf32, #tpu.memory_space<vmem>>, vector<1x8x8xf32>,
      %81 = vector.extract_strided_slice %68 {offsets = [0, 8], sizes = [8, 8], strides = [1, 1]} : vector<8x32xf32> to vector<8x8xf32>
      %c1_42 = arith.constant 1 : index
      %c0_43 = arith.constant 0 : index
      %c0_44 = arith.constant 0 : index
      %82 = vector.load %arg8[%c1_42, %c0_43, %c0_44] : memref<4x8x8xf32, #tpu.memory_space<vmem>>, vector<1x8x8xf32>
      %83 = vector.shape_cast %82 : vector<1x8x8xf32> to vector<8x8xf32>
      %84 = vector.shape_cast %81 : vector<8x8xf32> to vector<1x8x8xf32>
      tpu.vector_store %arg8[%c1_42, %c0_43, %c0_44], %84 {strides = array<i32>} : memref<4x8x8xf32, #tpu.memory_space<vmem>>, vector<1x8x8xf32>,
      %85 = vector.extract_strided_slice %63 {offsets = [0, 16], sizes = [8, 8], strides = [1, 1]} : vector<8x32xf32> to vector<8x8xf32>
      %c2 = arith.constant 2 : index
      %c0_45 = arith.constant 0 : index
      %c0_46 = arith.constant 0 : index
      %86 = vector.load %arg7[%c2, %c0_45, %c0_46] : memref<4x8x8xf32, #tpu.memory_space<vmem>>, vector<1x8x8xf32>
      %87 = vector.shape_cast %86 : vector<1x8x8xf32> to vector<8x8xf32>
      %88 = vector.shape_cast %85 : vector<8x8xf32> to vector<1x8x8xf32>
      tpu.vector_store %arg7[%c2, %c0_45, %c0_46], %88 {strides = array<i32>} : memref<4x8x8xf32, #tpu.memory_space<vmem>>, vector<1x8x8xf32>,
      %89 = vector.extract_strided_slice %68 {offsets = [0, 16], sizes = [8, 8], strides = [1, 1]} : vector<8x32xf32> to vector<8x8xf32>
      %c2_47 = arith.constant 2 : index
      %c0_48 = arith.constant 0 : index
      %c0_49 = arith.constant 0 : index
      %90 = vector.load %arg8[%c2_47, %c0_48, %c0_49] : memref<4x8x8xf32, #tpu.memory_space<vmem>>, vector<1x8x8xf32>
      %91 = vector.shape_cast %90 : vector<1x8x8xf32> to vector<8x8xf32>
      %92 = vector.shape_cast %89 : vector<8x8xf32> to vector<1x8x8xf32>
      tpu.vector_store %arg8[%c2_47, %c0_48, %c0_49], %92 {strides = array<i32>} : memref<4x8x8xf32, #tpu.memory_space<vmem>>, vector<1x8x8xf32>,
      %93 = vector.extract_strided_slice %63 {offsets = [0, 24], sizes = [8, 8], strides = [1, 1]} : vector<8x32xf32> to vector<8x8xf32>
      %c3 = arith.constant 3 : index
      %c0_50 = arith.constant 0 : index
      %c0_51 = arith.constant 0 : index
      %94 = vector.load %arg7[%c3, %c0_50, %c0_51] : memref<4x8x8xf32, #tpu.memory_space<vmem>>, vector<1x8x8xf32>
      %95 = vector.shape_cast %94 : vector<1x8x8xf32> to vector<8x8xf32>
      %96 = vector.shape_cast %93 : vector<8x8xf32> to vector<1x8x8xf32>
      tpu.vector_store %arg7[%c3, %c0_50, %c0_51], %96 {strides = array<i32>} : memref<4x8x8xf32, #tpu.memory_space<vmem>>, vector<1x8x8xf32>,
      %97 = vector.extract_strided_slice %68 {offsets = [0, 24], sizes = [8, 8], strides = [1, 1]} : vector<8x32xf32> to vector<8x8xf32>
      %c3_52 = arith.constant 3 : index
      %c0_53 = arith.constant 0 : index
      %c0_54 = arith.constant 0 : index
      %98 = vector.load %arg8[%c3_52, %c0_53, %c0_54] : memref<4x8x8xf32, #tpu.memory_space<vmem>>, vector<1x8x8xf32>
      %99 = vector.shape_cast %98 : vector<1x8x8xf32> to vector<8x8xf32>
      %100 = vector.shape_cast %97 : vector<8x8xf32> to vector<1x8x8xf32>
      tpu.vector_store %arg8[%c3_52, %c0_53, %c0_54], %100 {strides = array<i32>} : memref<4x8x8xf32, #tpu.memory_space<vmem>>, vector<1x8x8xf32>,
    } else {
    }
    %c8_i32 = arith.constant 8 : i32
    %3 = arith.muli %arg1, %c8_i32 : i32
    %4 = tpu.assume_multiple %3, 8 : i32
    %c0 = arith.constant 0 : index
    %5 = arith.index_cast %4 : i32 to index
    %c0_1 = arith.constant 0 : index
    %6 = vector.load %arg2[%c0, %5, %c0_1] : memref<1x8x32xf32, #tpu.memory_space<vmem>>, vector<1x8x32xf32>
    %7 = vector.shape_cast %6 : vector<1x8x32xf32> to vector<8x32xf32>
    %c0_2 = arith.constant 0 : index
    %c0_3 = arith.constant 0 : index
    %8 = vector.load %arg3[%c0_2, %c0_3] : memref<32x96xf32, #tpu.memory_space<vmem>>, vector<32x32xf32>
    %cst = arith.constant dense<0.000000e+00> : vector<8x32xf32>
    %9 = tpu.matmul %7, %8, %cst {dimension_numbers = #tpu.dot_dimension_numbers<[1], [0], [0], [1], [0, 0, 1, 1], [], []>} : vector<8x32xf32>, vector<32x32xf32>, vector<8x32xf32> -> vector<8x32xf32>
    %c0_4 = arith.constant 0 : index
    %c0_5 = arith.constant 0 : index
    %10 = vector.load %arg4[%c0_4, %c0_5] : memref<1x96xf32, #tpu.memory_space<vmem>>, vector<1x32xf32>
    %11 = vector.broadcast %10 : vector<1x32xf32> to vector<8x32xf32>
    %12 = arith.addf %9, %11 : vector<8x32xf32>
    %13 = vector.extract_strided_slice %12 {offsets = [0, 0], sizes = [8, 8], strides = [1, 1]} : vector<8x32xf32> to vector<8x8xf32>
    %14 = vector.extract_strided_slice %12 {offsets = [0, 8], sizes = [8, 8], strides = [1, 1]} : vector<8x32xf32> to vector<8x8xf32>
    %15 = vector.extract_strided_slice %12 {offsets = [0, 16], sizes = [8, 8], strides = [1, 1]} : vector<8x32xf32> to vector<8x8xf32>
    %16 = vector.extract_strided_slice %12 {offsets = [0, 24], sizes = [8, 8], strides = [1, 1]} : vector<8x32xf32> to vector<8x8xf32>
    %17 = vector.shape_cast %13 : vector<8x8xf32> to vector<1x8x8xf32>
    %18 = vector.shape_cast %14 : vector<8x8xf32> to vector<1x8x8xf32>
    %19 = vector.shape_cast %15 : vector<8x8xf32> to vector<1x8x8xf32>
    %20 = vector.shape_cast %16 : vector<8x8xf32> to vector<1x8x8xf32>
    %21 = tpu.concatenate %17, %18, %19, %20 in 0 : vector<1x8x8xf32>, vector<1x8x8xf32>, vector<1x8x8xf32>, vector<1x8x8xf32> -> vector<4x8x8xf32>
    %c0_6 = arith.constant 0 : index
    %c0_7 = arith.constant 0 : index
    %c0_8 = arith.constant 0 : index
    %22 = vector.load %arg7[%c0_6, %c0_7, %c0_8] : memref<4x8x8xf32, #tpu.memory_space<vmem>>, vector<4x8x8xf32>
    %c0_9 = arith.constant 0 : index
    %c0_10 = arith.constant 0 : index
    %c0_11 = arith.constant 0 : index
    %23 = vector.load %arg8[%c0_9, %c0_10, %c0_11] : memref<4x8x8xf32, #tpu.memory_space<vmem>>, vector<4x8x8xf32>
    "tpu.trace_start"() <{level = 10 : i32, message = "hqd,hkd->hqk"}> : () -> ()
    %cst_12 = arith.constant dense<0.000000e+00> : vector<4x8x8xf32>
    %24 = tpu.matmul %21, %22, %cst_12 {dimension_numbers = #tpu.dot_dimension_numbers<[2], [2], [1], [1], [0, 0, 0, 1, 1, 1], [0], [0]>} : vector<4x8x8xf32>, vector<4x8x8xf32>, vector<4x8x8xf32> -> vector<4x8x8xf32>
    "tpu.trace_stop"() : () -> ()
    %c0_13 = arith.constant 0 : index
    %c0_14 = arith.constant 0 : index
    %c0_15 = arith.constant 0 : index
    %25 = vector.load %arg5[%c0_13, %c0_14, %c0_15] : memref<1x1x8xf32, #tpu.memory_space<vmem>>, vector<1x1x8xf32>
    %26 = vector.shape_cast %25 : vector<1x1x8xf32> to vector<1x8xf32>
    %27 = vector.shape_cast %26 : vector<1x8xf32> to vector<1x1x8xf32>
    %28 = vector.broadcast %27 : vector<1x1x8xf32> to vector<4x8x8xf32>
    %29 = arith.addf %24, %28 : vector<4x8x8xf32>
    %cst_16 = arith.constant dense<0xFF800000> : vector<4x8xf32>
    %30 = vector.multi_reduction <maximumf>, %29, %cst_16 [2] : vector<4x8x8xf32> to vector<4x8xf32>
    %31 = vector.shape_cast %30 : vector<4x8xf32> to vector<4x8x1xf32>
    %32 = vector.broadcast %31 : vector<4x8x1xf32> to vector<4x8x8xf32>
    %33 = arith.subf %29, %32 : vector<4x8x8xf32>
    %34 = math.exp %33 : vector<4x8x8xf32>
    %cst_17 = arith.constant dense<0.000000e+00> : vector<4x8xf32>
    %35 = vector.multi_reduction <add>, %34, %cst_17 [2] : vector<4x8x8xf32> to vector<4x8xf32>
    %36 = vector.shape_cast %35 : vector<4x8xf32> to vector<4x8x1xf32>
    %37 = tpu.reciprocal %36 {approx = true} : vector<4x8x1xf32> -> vector<4x8x1xf32>
    %38 = arith.mulf %36, %37 : vector<4x8x1xf32>
    %cst_18 = arith.constant 2.000000e+00 : f32
    %39 = vector.broadcast %cst_18 : f32 to vector<4x8x1xf32>
    %40 = arith.subf %39, %38 : vector<4x8x1xf32>
    %41 = arith.mulf %37, %40 : vector<4x8x1xf32>
    "tpu.trace_start"() <{level = 10 : i32, message = "hqk,hkd->hqd"}> : () -> ()
    %cst_19 = arith.constant dense<0.000000e+00> : vector<4x8x8xf32>
    %42 = tpu.matmul %34, %23, %cst_19 {dimension_numbers = #tpu.dot_dimension_numbers<[2], [1], [1], [2], [0, 0, 0, 1, 1, 2], [0], [0]>} : vector<4x8x8xf32>, vector<4x8x8xf32>, vector<4x8x8xf32> -> vector<4x8x8xf32>
    "tpu.trace_stop"() : () -> ()
    %43 = vector.broadcast %41 : vector<4x8x1xf32> to vector<4x8x8xf32>
    %44 = arith.mulf %42, %43 : vector<4x8x8xf32>
    %45 = vector.extract_strided_slice %44 {offsets = [0, 0, 0], sizes = [1, 8, 8], strides = [1, 1, 1]} : vector<4x8x8xf32> to vector<1x8x8xf32>
    %46 = vector.shape_cast %45 : vector<1x8x8xf32> to vector<8x8xf32>
    %47 = vector.extract_strided_slice %44 {offsets = [1, 0, 0], sizes = [1, 8, 8], strides = [1, 1, 1]} : vector<4x8x8xf32> to vector<1x8x8xf32>
    %48 = vector.shape_cast %47 : vector<1x8x8xf32> to vector<8x8xf32>
    %49 = vector.extract_strided_slice %44 {offsets = [2, 0, 0], sizes = [1, 8, 8], strides = [1, 1, 1]} : vector<4x8x8xf32> to vector<1x8x8xf32>
    %50 = vector.shape_cast %49 : vector<1x8x8xf32> to vector<8x8xf32>
    %51 = vector.extract_strided_slice %44 {offsets = [3, 0, 0], sizes = [1, 8, 8], strides = [1, 1, 1]} : vector<4x8x8xf32> to vector<1x8x8xf32>
    %52 = vector.shape_cast %51 : vector<1x8x8xf32> to vector<8x8xf32>
    %53 = tpu.concatenate %46, %48, %50, %52 in 1 : vector<8x8xf32>, vector<8x8xf32>, vector<8x8xf32>, vector<8x8xf32> -> vector<8x32xf32>
    %c0_20 = arith.constant 0 : index
    %c0_21 = arith.constant 0 : index
    %c0_22 = arith.constant 0 : index
    %54 = vector.load %arg6[%c0_20, %c0_21, %c0_22] : memref<1x8x32xf32, #tpu.memory_space<vmem>>, vector<1x8x32xf32>
    %55 = vector.shape_cast %54 : vector<1x8x32xf32> to vector<8x32xf32>
    %56 = vector.shape_cast %53 : vector<8x32xf32> to vector<1x8x32xf32>
    tpu.vector_store %arg6[%c0_20, %c0_21, %c0_22], %56 {strides = array<i32>} : memref<1x8x32xf32, #tpu.memory_space<vmem>>, vector<1x8x32xf32>,
    return
  }
  func.func @transform_0(%arg0: i32, %arg1: i32) -> (i32, i32, i32) {
    %c0_i32 = arith.constant 0 : i32
    %c0_i32_0 = arith.constant 0 : i32
    %c0_i32_1 = arith.constant 0 : i32
    return %arg0, %c0_i32, %c0_i32_0 : i32, i32, i32
  }
  func.func @transform_1(%arg0: i32, %arg1: i32) -> (i32, i32) {
    %c0_i32 = arith.constant 0 : i32
    %c0_i32_0 = arith.constant 0 : i32
    %c0_i32_1 = arith.constant 0 : i32
    return %c0_i32, %c0_i32_0 : i32, i32
  }
  func.func @transform_2(%arg0: i32, %arg1: i32) -> (i32, i32) {
    %c0_i32 = arith.constant 0 : i32
    %c0_i32_0 = arith.constant 0 : i32
    %c0_i32_1 = arith.constant 0 : i32
    return %c0_i32, %c0_i32_0 : i32, i32
  }
  func.func @transform_3(%arg0: i32, %arg1: i32) -> (i32, i32, i32) {
    %c0_i32 = arith.constant 0 : i32
    %c0_i32_0 = arith.constant 0 : i32
    %c0_i32_1 = arith.constant 0 : i32
    return %arg0, %c0_i32, %c0_i32_0 : i32, i32, i32
  }
  func.func @transform_4(%arg0: i32, %arg1: i32) -> (i32, i32, i32) {
    %c0_i32 = arith.constant 0 : i32
    %c0_i32_0 = arith.constant 0 : i32
    return %arg0, %arg1, %c0_i32 : i32, i32, i32
  }
}

</mosaic_0001>

<bundles_post_ra>
// kernel: tpu_custom_call.1
= control target key start
LH: loop header
LB: loop body
LE: loop exit
PB: predicated region body
PF: predicated region fallthrough
CT: control target
= control target key end

     0   :  { %s2076_s0 = inlined_call_operand.hbm [shape: f32[2,8,32], index: 0, kind: input, shape index: {}]   ;;  %s2077_s1 = inlined_call_operand.hbm [shape: f32[32,96], index: 1, kind: input, shape index: {}]   ;;  %s2078_s2 = inlined_call_operand.vmem [shape: f32[1,96], index: 2, kind: input, shape index: {}]   ;;  %s2079_s3 = inlined_call_operand.vmem [shape: f32[2,1,8], index: 3, kind: input, shape index: {}]   ;;  %s2080_s4 = inlined_call_operand.hbm [shape: f32[2,8,32], index: 4, kind: output, shape index: {}]  }
   0x1   :  { %2082 = sst [smem:[#allocation13_spill]] %s2077_s1 }
   0x2   :  { %9 = vsyncpa [#allocation5], 0 }
   0x3   :  { %11 = vsyncpa [#allocation5 + $0x1], 0 }
   0x4   :  { %12 = vsyncpa [#allocation8], 0 }
   0x5   :  { %13 = vsyncpa [#allocation6], 0 }
   0x6   :  { %15 = vsyncpa [#allocation6 + $0x1], 0  ;;  %s1794_s15 = smov 0   ;;  %s1796_s16 = smov 0  }
   0x7   :  { %s1798_s17 = smov 0   ;;  %s1800_s18 = smov 0  }
   0x8   :  { %s1802_s19 = smov 0   ;;  %s1804_s20 = smov 0  }
   0x9 LB: > { %s1376_s21 = sadd.s32 4294967295, %s1752_s20   ;;  %s1377_s22 = sadd.s32 4294967294, %s1752_s20   ;;  %s1752_s20 = sphi %s1804_s20, %s21_s20   ;;  %s1748_s19 = sphi %s1802_s19, %s2100_s19   ;;  %s1744_s18 = sphi %s1800_s18, %s2099_s18   ;;  %s1740_s17 = sphi %s1798_s17, %s2098_s17   ;;  %s1736_s16 = sphi %s1796_s16, %s2097_s16   ;;  %s1732_s15 = sphi %s1794_s15, %s2096_s15  }
   0xa   : > { %p53_p0 = scmp.ne.s32.totalorder %s1736_s16, %s1732_s15  ;;  %p1828_p1 = scmp.eq.s32.totalorder %s1376_s21, 0 }
   0xb   : > { %p1832_p2 = scmp.eq.s32.totalorder %s1376_s21, 1  ;;  %p153_p3 = scmp.eq.s32.totalorder %s1377_s22, 1 }
   0xc   : > { %p1838_p4 = por %p1828_p1, %p53_p0  ;;  %p1378_p5 = scmp.ge.s32.totalorder %s1752_s20, 1 }
   0xd   : > { %p1843_p6 = por %p153_p3, %p53_p0  ;;  %p160_p7 = scmp.lt.s32.totalorder %s1752_s20, 3 }
   0xe   : > { %s2085_s25 = scalar_select %p1838_p4, 1, 0 }
   0xf   : > { %s2086_s26 = scalar_select %p1843_p6, 1, 0 }
  0x10   : > { %p1848_p8 = pnand %p1378_p5, %p160_p7  ;;  %s1754_s28 = smov [#allocation7]  }
  0x11   : > { %s172_s29 = sshll.u32 %s1754_s28, 4  ;;  %s33_s5 = sadd.s32 1, %s1748_s19  ;;  %s173_s29 = int_to_ptr.vmem [resolvable:$true] %s172_s29 }
  0x12   : > { %p1521_p9 = pneg %p1848_p8  ;;  %s1625_s6 = scalar_lea.vmem %s173_s29, 512 }
  0x13   : > { %p1626_p13 = scmp.ne.s32.totalorder %s173_s29, %s1625_s6  ;;  %p1633_p5 = scmp.lt.s32.totalorder %s173_s29, %s173_s29 }
  0x14   : > { %p1857_p11 = pnand %p1521_p9, %p1828_p1  ;;  %p1634_p7 = scmp.lt.s32.totalorder %s1625_s6, %s1625_s6 }
  0x16   : > { %p1616_p12 = pneg %p1857_p11  ;;  %p1635_p6 = por %p1634_p7, %p1633_p5 }
  0x18   : > { %p1628_p0 = pnand %p1626_p13, %p1616_p12 }
  0x1a   : > { %p1629_p3 = pneg %p1628_p0 }
  0x1c   : > { %p1636_p4 = pnand %p1635_p6, %p1629_p3 }
  0x1e   : > { %1639 = shalt.err (!%p1636_p4)
}
  0x1f   : > { %s1755_s7 = smov 128   ;;  %s1756_s8 = smov 8  }
  0x20   : > { %s2089_s1 = sld [smem:[#allocation13_spill]]  ;;  %p35_p6 = scmp.ge.s32.totalorder %s33_s5, 2 }
  0x21   : > { %s40_s11 = sadd.s32 1, %s1740_s17  ;;  %p47_p4 = scmp.ne.s32.totalorder %s1740_s17, %s1736_s16 }
  0x22   : > { %p48_p9 = scmp.eq.s32.totalorder %s1752_s20, 0  ;;  %s2102_s5 = smov (%p35_p6, %s33_s5), 0 }
  0x23   : > { %p1881_p13 = por %p1832_p2, %p47_p4  ;;  %s37_s14 = ssub.s32 %s1748_s19, %s2102_s5 }
  0x24   : > { %p1875_p12 = por %p48_p9, %p47_p4  ;;  %p1534_p0 = scmp.lt.s32.totalorder %s1752_s20, 2 }
  0x25   : > { %s189_s21 = sand.u32 1, %s1740_s17  }
  0x26   : > { %1524 = dma.hbm_to_vmem [thread:$0]  (!%p1857_p11), %s2089_s1, 512, %s173_s29, [#allocation8], %s1755_s7, %s1755_s7, %s1756_s8  }
  0x27   : > { %p38_p11 = scmp.eq.s32.totalorder %s37_s14, 0  ;;  %s1381_s22 = sshll.u32 %s189_s21, 3 }
  0x28   : > { %s1382_s29 = sshll.u32 %s1748_s19, 7  ;;  %s193_s8 = scalar_lea.vmem [#allocation4], %s1381_s22 }
  0x29   : > { %s1890_s28 = scalar_select %p38_p11, %s1740_s17, %s40_s11  }
  0x2a   : > { %s198_s7 = scalar_lea.hbm %s2076_s0, %s1382_s29  ;;  %s200_s9 = sshll.u32 %s193_s8, 4  ;;  %s201_s9 = int_to_ptr.vmem [resolvable:$true] %s200_s9 }
  0x2b   : > { %p1898_p2 = pnand %p1534_p0, %p1875_p12  ;;  %s190_s10 = scalar_lea.sflag [#allocation5], %s189_s21 }
  0x2c   : > { %s1653_s14 = scalar_lea.vmem %s201_s9, 128  ;;  %s1757_s11 = smov [#allocation4]  }
  0x2d   : > { %p1642_p3 = pneg %p1898_p2  ;;  %p1654_p5 = scmp.ne.s32.totalorder %s201_s9, %s1653_s14 }
  0x2e   : > { %s1658_s1 = sshll.u32 %s1757_s11, 4  ;;  %s1659_s1 = int_to_ptr.vmem [resolvable:$false] %s1658_s1 }
  0x2f   : > { %p1656_p7 = pnand %p1654_p5, %p1642_p3  ;;  %s1660_s29 = scalar_lea.vmem %s1659_s1, 256 }
  0x30   : > { %p1661_p4 = scmp.lt.s32.totalorder %s201_s9, %s1659_s1  ;;  %p1662_p9 = scmp.lt.s32.totalorder %s1660_s29, %s1653_s14 }
  0x31   : > { %p1657_p6 = pneg %p1656_p7 }
  0x32   : > { %p1663_p11 = por %p1662_p9, %p1661_p4 }
  0x34   : > { %p1664_p10 = pnand %p1663_p11, %p1657_p6 }
  0x36   : > { %1667 = shalt.err (!%p1664_p10)
}
  0x37   : > { %1528 = dma.hbm_to_vmem [thread:$0]  (!%p1898_p2), %s198_s7, 128, %s201_s9, %s190_s10  }
  0x38   : > { %215 = sbr.rel (%p1848_p8) target bundleno = 1196 (0x4ac), region = 36  ;;  %s1909_s12 = sand.u32 (!%p1848_p8), 1, %s1736_s16  }
  0x39   : > { %s1384_s21 = sshll.u32 (!%p1848_p8), %s1909_s12, 3  ;;  %s218_s22 = scalar_lea.sflag (!%p1848_p8), [#allocation5], %s1909_s12 }
  0x3a   : > { %s1915_s1 = scalar_lea.vmem (!%p1848_p8), [#allocation4], %s1384_s21  ;;  %p2093_p12 = scmp.ne.s32.totalorder (!%p1848_p8), %s2085_s25, 0 }
  0x3d   : > { %1719 = dma.done.wait (%p2093_p12), %s218_s22, 128  }
  0x3e   : > { %1721 = vsyncadd (%p2093_p12), %s218_s22, 4294967168 }
  0x3f   : > { %1723 = dma.done.wait (%p1828_p1), [#allocation8], 512  }
  0x40   : > { %1725 = vsyncadd (%p1828_p1), [#allocation8], 4294966784  ;;  %v1758_v0 = vmov 0.0   ;;  %vm1759_vm0 = vmmov 0   ;;  %v264_v1 = vld [vmem:[#allocation7 + $0x18] sm:$0xff]  ;;  %v262_v2 = vld [vmem:[#allocation7 + $0x8] sm:$0xff] }
  0x41   : > { %1440 = vmatprep.subr.mxu0 %v1758_v0  ;;  %1451 = vmatprep.subr.mxu1 %v1758_v0  ;;  %s1760_s25 = smov 96   ;;  %v263_v3 = vld [vmem:[#allocation7 + $0x10] sm:$0xff]  ;;  %v261_v4 = vld [vmem:[#allocation7] sm:$0xff]  ;;  %s1761_s30 = smov 64   ;;  %vm290_vm1 = vcmask 261120   ;;  %vm449_vm2 = vcmask 64512  }
  0x42   : > { %1448 = vmatprep.mubr.msk.f32.mxu0 %vm1759_vm0, %v1758_v0  ;;  %1459 = vmatprep.mubr.msk.f32.mxu1 %vm1759_vm0, %v1758_v0  ;;  %v1934_v5 = vld [vmem:[%s2078_s2] ss:$0 sm:$0xff]  ;;  %s1762_s6 = smov 104   ;;  %s1763_s7 = smov 120   ;;  %vm1256_vm3 = vcmask 130048   ;;  %vm1258_vm4 = vcmask 195584  }
  0x43   : > { %281 = vrot.lane.b32.xlu0 %v264_v1, %s1760_s25  ;;  %277 = vrot.lane.b32.xlu1 %v262_v2, %s1760_s25  ;;  %v260_v10 = vld [vmem:[%s1915_s1] sm:$0xff]  ;;  %s1764_s8 = smov 112   ;;  %p253_p1 = scmp.lt.s32.totalorder %s1744_s18, 1 }
  0x44   : > { %s1765_s11 = smov 8   ;;  %s1766_s29 = smov 16  }
  0x45   : > { %s254_s9 = scalar_select %p253_p1, %s1744_s18, 1 }
  0x46   : > { %s1767_s22 = smov 24   ;;  %s1406_s1 = sshll.u32 %s1744_s18, 7 }
  0x47   : > { %279 = vrot.lane.b32.xlu0 %v263_v3, %s1760_s25  ;;  %275 = vrot.lane.b32.xlu1 %v261_v4, %s1760_s25  ;;  %s255_s14 = scalar_lea.vmem %s2079_s3, %s254_s9  ;;  %s1768_s18 = smov [#allocation9]  }
  0x48   : > { %v1392_v37 = vld [vmem:[%s255_s14] ss:$0 sm:$0xff] }
  0x4b   : > { %287 = vrot.lane.b32.xlu0 %v1934_v5, %s1760_s25  ;;  %370 = vrot.lane.b32.xlu1 %v264_v1, %s1761_s30  ;;  %s252_s25 = scalar_lea.vmem [#allocation9], %s1384_s21  ;;  %s1672_s21 = sshll.u32 %s1768_s18, 4  ;;  %s1673_s21 = int_to_ptr.vmem [resolvable:$false] %s1672_s21 }
  0x4c   : > { %s1276_s23 = sshll.u32 %s252_s25, 4  ;;  %s1674_s9 = scalar_lea.vmem %s1673_s21, 256  ;;  %s1277_s23 = int_to_ptr.vmem [resolvable:$true] %s1276_s23 }
  0x4d   : > { %p1675_p2 = scmp.lt.s32.totalorder %s1277_s23, %s1673_s21 }
  0x4f   : > { %368 = vrot.lane.b32.xlu0 %v263_v3, %s1761_s30  ;;  %366 = vrot.lane.b32.xlu1 %v262_v2, %s1761_s30 }
  0x53   : > { %364 = vrot.lane.b32.xlu1 %v261_v4, %s1761_s30 }
  0xb5   : > { %v282_v6 = vpop.permute.xlu0 %281  ;;  %v278_v7 = vpop.permute.xlu1 %277 }
  0xb6   : > { %1441 = vmatpush3.msra.mxu0 %v282_v6 }
  0xb7   : > { %1442 = vmatprep.subr.mxu0 %v1758_v0 }
  0xb9   : > { %v280_v8 = vpop.permute.xlu0 %279  ;;  %v276_v9 = vpop.permute.xlu1 %275 }
  0xba   : > { %1443 = vmatpush3.msra.mxu0 %v280_v8 }
  0xbb   : > { %1444 = vmatprep.subr.mxu0 %v1758_v0 }
  0xbc   : > { %1445 = vmatpush3.msra.mxu0 %v278_v7 }
  0xbd   : > { %1446 = vmatprep.subr.mxu0 %v1758_v0  ;;  %v371_v11 = vpop.permute.xlu1 %370  ;;  %v288_v12 = vpop.permute.xlu0 %287 }
  0xbe   : > { %1447 = vmatpush3.msra.mxu0 %v276_v9  ;;  %1452 = vmatpush3.msra.mxu1 %v371_v11 }
  0xbf   : > { %1449 = vmatmul.mubr.msk.f32.vlgmr.msra.gmra.mxu0 %vm290_vm1, %v260_v10  ;;  %1462 = vmatprep.subr.mxu0 %v1758_v0 }
  0xc0   : > { %1463 = vmatpush3.msra.mxu0 %v264_v1  ;;  %1470 = vmatprep.mubr.msk.f32.mxu0 %vm1759_vm0, %v1758_v0 }
  0xc1   : > { %1464 = vmatprep.subr.mxu0 %v1758_v0  ;;  %1453 = vmatprep.subr.mxu1 %v1758_v0  ;;  %v369_v13 = vpop.permute.xlu0 %368  ;;  %v367_v14 = vpop.permute.xlu1 %366 }
  0xc2   : > { %1465 = vmatpush3.msra.mxu0 %v263_v3  ;;  %1454 = vmatpush3.msra.mxu1 %v369_v13 }
  0xc3   : > { %1466 = vmatprep.subr.mxu0 %v1758_v0  ;;  %1455 = vmatprep.subr.mxu1 %v1758_v0 }
  0xc4   : > { %1467 = vmatpush3.msra.mxu0 %v262_v2  ;;  %1456 = vmatpush3.msra.mxu1 %v367_v14 }
  0xc5   : > { %1468 = vmatprep.subr.mxu0 %v1758_v0  ;;  %1457 = vmatprep.subr.mxu1 %v1758_v0  ;;  %v365_v15 = vpop.permute.xlu1 %364 }
  0xc6   : > { %1469 = vmatpush3.msra.mxu0 %v261_v4  ;;  %1458 = vmatpush3.msra.mxu1 %v365_v15 }
  0xc7   : > { %1471 = vmatmul.mubr.msk.f32.vlgmr.msra.gmra.mxu0 %vm290_vm1, %v260_v10  ;;  %1483 = vmatprep.subr.mxu0 %v1758_v0 }
  0xc8   : > { %1485 = vmatprep.mubr.msk.f32.mxu0 %vm1759_vm0, %v1758_v0  ;;  %1460 = vmatmul.mubr.msk.f32.vlgmr.msra.gmra.mxu1 %vm290_vm1, %v260_v10 }
  0xc9   : > { %1473 = vmatprep.subr.mxu1 %v1758_v0  ;;  %1475 = vmatprep.mubr.msk.f32.mxu1 %vm1759_vm0, %v1758_v0 }
 0x17f   : > { %v360_v16 = vpop.f32.mrf.mxu0 }
 0x180   : > { %v361_v17 = vadd.f32 %v360_v16, %v288_v12 }
 0x181   : > { %v1450_v18 = vpop.f32.mrf.mxu0 }
 0x182   : > { %450 = vst.msk [vmem:[#allocation2] sm:$0xff] %vm449_vm2, %v361_v17  ;;  %474 = vrot.lane.b32.xlu1 %v361_v17, %s1762_s6  ;;  %453 = vrot.lane.b32.xlu0 %v361_v17, %s1763_s7 }
 0x186   : > { %464 = vrot.lane.b32.xlu0 %v361_v17, %s1764_s8 }
 0x187   : > { %v568_v19 = vpop.f32.mrf.mxu0 }
 0x188   : > { %v569_v20 = vadd.f32 %v1934_v5, %v568_v19  ;;  %v445_v23 = vpop.f32.mrf.mxu1 }
 0x189   : > { %v579_v21 = vld [vmem:[#allocation2] sm:$0xff]  ;;  %v1472_v22 = vpop.f32.mrf.mxu0 }
 0x18a   : > { %1474 = vmatpush3.xpose.msk.msra.mxu1 %vm449_vm2, %v579_v21  ;;  %573 = vrot.lane.b32.xlu0 %v569_v20, %s1763_s7  ;;  %v1461_v24 = vpop.f32.mrf.mxu1 }
 0x18b   : > { %575 = vrot.lane.b32.xlu1 %v569_v20, %s1764_s8  ;;  %1478 = vmatprep.subr.mxu1 %v1758_v0 }
 0x18d   : > { %1476 = vmatmul.mubr.msk.f32.vlgmr.msra.gmra.mxu1 %vm449_vm2, %v569_v20 }
 0x18e   : > { %577 = vrot.lane.b32.xlu0 %v569_v20, %s1762_s6  ;;  %1480 = vmatprep.mubr.msk.f32.mxu1 %vm1759_vm0, %v1758_v0 }
 0x18f   : > { %376 = vrot.lane.b32.xlu1 %v1934_v5, %s1761_s30 }
 0x1f4   : > { %v475_v25 = vpop.permute.xlu1 %474  ;;  %v454_v26 = vpop.permute.xlu0 %453 }
 0x1f5   : > { %478 = vst.msk [vmem:[#allocation2 + $0x18] sm:$0xff] %vm449_vm2, %v475_v25  ;;  %457 = vst.msk [vmem:[#allocation2 + $0x8] sm:$0xff] %vm449_vm2, %v454_v26 }
 0x1f8   : > { %v465_v27 = vpop.permute.xlu0 %464 }
 0x1f9   : > { %468 = vst.msk [vmem:[#allocation2 + $0x10] sm:$0xff] %vm449_vm2, %v465_v27 }
 0x1fc   : > { %v580_v28 = vld [vmem:[#allocation2 + $0x8] sm:$0xff]  ;;  %v574_v29 = vpop.permute.xlu0 %573  ;;  %v582_v32 = vld [vmem:[#allocation2 + $0x18] sm:$0xff] }
 0x1fd   : > { %1479 = vmatpush3.xpose.msk.msra.mxu1 %vm449_vm2, %v580_v28  ;;  %v576_v30 = vpop.permute.xlu1 %575 }
 0x1fe   : > { %1488 = vmatprep.subr.mxu1 %v1758_v0 }
 0x200   : > { %1481 = vmatmul.mubr.msk.f32.vlgmr.msra.gmra.mxu1 %vm449_vm2, %v574_v29  ;;  %v581_v31 = vld [vmem:[#allocation2 + $0x10] sm:$0xff]  ;;  %v578_v33 = vpop.permute.xlu0 %577 }
 0x201   : > { %1484 = vmatpush3.xpose.msk.msra.mxu0 %vm449_vm2, %v581_v31  ;;  %1489 = vmatpush3.xpose.msk.msra.mxu1 %vm449_vm2, %v582_v32  ;;  %v377_v34 = vpop.permute.xlu1 %376 }
 0x202   : > { %1490 = vmatprep.mubr.msk.f32.mxu1 %vm1759_vm0, %v1758_v0  ;;  %v446_v35 = vadd.f32 %v445_v23, %v377_v34  ;;  %1493 = vmatprep.subr.mxu0 %v1758_v0 }
 0x203   : > { %1498 = vmatprep.subr.mxu1 %v1758_v0 }
 0x204   : > { %1486 = vmatmul.mubr.msk.f32.vlgmr.msra.gmra.mxu0 %vm449_vm2, %v576_v30  ;;  %1491 = vmatmul.mubr.msk.f32.vlgmr.msra.gmra.mxu1 %vm449_vm2, %v578_v33  ;;  %451 = vst.msk [vmem:[#allocation3] sm:$0xff] %vm449_vm2, %v446_v35 }
 0x205   : > { %459 = vrot.lane.b32.xlu1 %v446_v35, %s1763_s7  ;;  %1495 = vmatprep.mubr.msk.f32.mxu0 %vm1759_vm0, %v1758_v0  ;;  %s1262_s7 = scalar_lea.sflag [#allocation6], %s1909_s12 }
 0x206   : > { %1500 = vmatprep.mubr.msk.f32.mxu1 %vm1759_vm0, %v1758_v0 }
 0x20b   : > { %v583_v36 = vld [vmem:[#allocation3] sm:$0xff] }
 0x20c   : > { %1494 = vmatpush3.msra.mxu0 %v583_v36 }
 0x20d   : > { %1503 = vmatprep.subr.mxu0 %v1758_v0 }
 0x24d   : > { %v666_v38 = vpop.f32.mrf.mxu1 }
 0x24e   : > { %v667_v39 = vadd.f32 %v1392_v37, %v666_v38 }
 0x24f   : > { %v1477_v40 = vpop.f32.mrf.mxu1 }
 0x250   : > { %v895_v41 = vsel %vm449_vm2, %v667_v39, -inf }
 0x251   : > { %896 = vmax.xlane.f32.xlu0 %v895_v41 }
 0x277   : > { %v460_v42 = vpop.permute.xlu1 %459 }
 0x278   : > { %463 = vst.msk [vmem:[#allocation3 + $0x8] sm:$0xff] %vm449_vm2, %v460_v42 }
 0x27f   : > { %v584_v43 = vld [vmem:[#allocation3 + $0x8] sm:$0xff] }
 0x280   : > { %1499 = vmatpush3.msra.mxu1 %v584_v43 }
 0x281   : > { %1508 = vmatprep.subr.mxu1 %v1758_v0 }
 0x2c0   : > { %v741_v44 = vpop.f32.mrf.mxu1 }
 0x2c1   : > { %v742_v45 = vadd.f32 %v1392_v37, %v741_v44 }
 0x2c2   : > { %v1482_v46 = vpop.f32.mrf.mxu1 }
 0x2c3   : > { %v898_v47 = vsel %vm449_vm2, %v742_v45, -inf }
 0x2c4   : > { %899 = vmax.xlane.f32.xlu1 %v898_v47  ;;  %v816_v48 = vpop.f32.mrf.mxu0  ;;  %v891_v49 = vpop.f32.mrf.mxu1 }
 0x2c5   : > { %v817_v50 = vadd.f32 %v1392_v37, %v816_v48  ;;  %v892_v53 = vadd.f32 %v1392_v37, %v891_v49 }
 0x2c6   : > { %v1487_v51 = vpop.f32.mrf.mxu0  ;;  %v1492_v52 = vpop.f32.mrf.mxu1 }
 0x2c7   : > { %v901_v54 = vsel %vm449_vm2, %v817_v50, -inf  ;;  %v904_v55 = vsel %vm449_vm2, %v892_v53, -inf }
 0x2c8   : > { %902 = vmax.xlane.f32.xlu0 %v901_v54 }
 0x2cc   : > { %905 = vmax.xlane.f32.xlu0 %v904_v55 }
 0x2d5   : > { %479 = vrot.lane.b32.xlu1 %v446_v35, %s1762_s6  ;;  %s2033_s6 = scalar_lea.hbm %s2080_s4, %s1406_s1 }
 0x2da   : > { %v897_v56 = vpop.xlane.xlu0 %896 }
 0x2db   : > { %v907_v57 = vsub.f32 %v667_v39, %v897_v56 }
 0x2dd   : > { %v911_v58 = vmul.f32 1.442695, %v907_v57 }
 0x2df   : > { %1598 = vpow2.f32 %v911_v58 }
 0x2e2   : > { %469 = vrot.lane.b32.xlu0 %v446_v35, %s1764_s8  ;;  %s1668_s8 = scalar_lea.vmem %s1277_s23, 128 }
 0x2e3   : > { %p1669_p8 = scmp.ne.s32.totalorder %s1277_s23, %s1668_s8  ;;  %p1676_p3 = scmp.lt.s32.totalorder %s1674_s9, %s1668_s8 }
 0x2e5   : > { %p1670_p10 = pnand %p1669_p8, %p1881_p13  ;;  %p1677_p5 = por %p1676_p3, %p1675_p2 }
 0x2e7   : > { %p1671_p0 = pneg %p1670_p10 }
 0x2e9   : > { %p1678_p7 = pnand %p1677_p5, %p1671_p0 }
 0x2ec   : > { %v1599_v59 = vpop.eup %1598 }
 0x2ed   : > { %1496 = vmatmul.mubr.msk.f32.vlgmr.msra.gmra.mxu0 %vm449_vm2, %v1599_v59  ;;  %v919_v13 = vsel %vm449_vm2, %v1599_v59, 0.0 }
 0x2ee   : > { %1505 = vmatprep.mubr.msk.f32.mxu0 %vm1759_vm0, %v1758_v0 }
 0x34d   : > { %v900_v60 = vpop.xlane.xlu1 %899 }
 0x34e   : > { %v908_v61 = vsub.f32 %v742_v45, %v900_v60 }
 0x350   : > { %v913_v62 = vmul.f32 1.442695, %v908_v61 }
 0x351   : > { %v480_v63 = vpop.permute.xlu1 %479  ;;  %v903_v1 = vpop.xlane.xlu0 %902 }
 0x352   : > { %1600 = vpow2.f32 %v913_v62  ;;  %483 = vst.msk [vmem:[#allocation3 + $0x18] sm:$0xff] %vm449_vm2, %v480_v63  ;;  %v909_v2 = vsub.f32 %v817_v50, %v903_v1 }
 0x354   : > { %v915_v3 = vmul.f32 1.442695, %v909_v2 }
 0x355   : > { %v906_v4 = vpop.xlane.xlu0 %905 }
 0x356   : > { %1602 = vpow2.f32 %v915_v3  ;;  %v910_v5 = vsub.f32 %v892_v53, %v906_v4 }
 0x358   : > { %v917_v6 = vmul.f32 1.442695, %v910_v5 }
 0x359   : > { %v470_v7 = vpop.permute.xlu0 %469  ;;  %v586_v9 = vld [vmem:[#allocation3 + $0x18] sm:$0xff] }
 0x35a   : > { %1604 = vpow2.f32 %v917_v6  ;;  %473 = vst.msk [vmem:[#allocation3 + $0x10] sm:$0xff] %vm449_vm2, %v470_v7 }
 0x35f   : > { %v1601_v8 = vpop.eup %1600 }
 0x360   : > { %1501 = vmatmul.mubr.msk.f32.vlgmr.msra.gmra.mxu1 %vm449_vm2, %v1601_v8  ;;  %v922_v10 = vsel %vm449_vm2, %v1601_v8, 0.0 }
 0x361   : > { %1509 = vmatpush3.msra.mxu1 %v586_v9  ;;  %923 = vadd.xlane.f32.xlu1 %v922_v10  ;;  %v585_v11 = vld [vmem:[#allocation3 + $0x10] sm:$0xff] }
 0x362   : > { %1504 = vmatpush3.msra.mxu0 %v585_v11  ;;  %1510 = vmatprep.mubr.msk.f32.mxu1 %vm1759_vm0, %v1758_v0 }
 0x363   : > { %v1603_v12 = vpop.eup %1602 }
 0x364   : > { %1506 = vmatmul.mubr.msk.f32.vlgmr.msra.gmra.mxu0 %vm449_vm2, %v1603_v12  ;;  %v925_v14 = vsel %vm449_vm2, %v1603_v12, 0.0 }
 0x365   : > { %920 = vadd.xlane.f32.xlu1 %v919_v13  ;;  %926 = vadd.xlane.f32.xlu0 %v925_v14 }
 0x367   : > { %v1605_v15 = vpop.eup %1604 }
 0x368   : > { %1511 = vmatmul.mubr.msk.f32.vlgmr.msra.gmra.mxu1 %vm449_vm2, %v1605_v15  ;;  %v928_v16 = vsel %vm449_vm2, %v1605_v15, 0.0 }
 0x369   : > { %929 = vadd.xlane.f32.xlu0 %v928_v16 }
 0x3ad   : > { %v1016_v17 = vpop.f32.mrf.mxu0 }
 0x3af   : > { %v1497_v18 = vpop.f32.mrf.mxu0 }
 0x3ea   : > { %v924_v19 = vpop.xlane.xlu1 %923 }
 0x3eb   : > { %1606 = vrcp.f32 %v924_v19 }
 0x3ee   : > { %v927_v20 = vpop.xlane.xlu0 %926  ;;  %v921_v42 = vpop.xlane.xlu1 %920 }
 0x3ef   : > { %1608 = vrcp.f32 %v927_v20 }
 0x3f2   : > { %v930_v0 = vpop.xlane.xlu0 %929 }
 0x3f3   : > { %1610 = vrcp.f32 %v930_v0 }
 0x3f4   : > { %1612 = vrcp.f32 %v921_v42 }
 0x3f8   : > { %v1607_v21 = vpop.eup %1606 }
 0x3f9   : > { %v936_v22 = vmul.f32 %v1607_v21, %v924_v19 }
 0x3fb   : > { %v940_v24 = vsub.f32 2.0, %v936_v22 }
 0x3fc   : > { %v1609_v23 = vpop.eup %1608 }
 0x3fd   : > { %v937_v25 = vmul.f32 %v1609_v23, %v927_v20  ;;  %v944_v29 = vmul.f32 %v1607_v21, %v940_v24 }
 0x3ff   : > { %v941_v27 = vsub.f32 2.0, %v937_v25 }
 0x400   : > { %v1611_v26 = vpop.eup %1610 }
 0x401   : > { %v938_v28 = vmul.f32 %v1611_v26, %v930_v0  ;;  %v945_v34 = vmul.f32 %v1609_v23, %v941_v27  ;;  %v1613_v43 = vpop.eup %1612 }
 0x402   : > { %v935_v44 = vmul.f32 %v1613_v43, %v921_v42 }
 0x403   : > { %v942_v33 = vsub.f32 2.0, %v938_v28 }
 0x404   : > { %v939_v45 = vsub.f32 2.0, %v935_v44 }
 0x405   : > { %v946_v38 = vmul.f32 %v1611_v26, %v942_v33 }
 0x406   : > { %v943_v46 = vmul.f32 %v1613_v43, %v939_v45 }
 0x408   : > { %v1239_v49 = vmul.f32 %v1016_v17, %v943_v46 }
 0x420   : > { %v1089_v30 = vpop.f32.mrf.mxu1 }
 0x421   : > { %v1240_v31 = vmul.f32 %v1089_v30, %v944_v29 }
 0x422   : > { %v1502_v32 = vpop.f32.mrf.mxu1 }
 0x423   : > { %1244 = vrot.lane.b32.xlu0 %v1240_v31, %s1765_s11 }
 0x424   : > { %v1162_v35 = vpop.f32.mrf.mxu0 }
 0x425   : > { %v1241_v36 = vmul.f32 %v1162_v35, %v945_v34 }
 0x426   : > { %v1507_v37 = vpop.f32.mrf.mxu0 }
 0x427   : > { %1248 = vrot.lane.b32.xlu1 %v1241_v36, %s1766_s29 }
 0x428   : > { %v1235_v39 = vpop.f32.mrf.mxu1 }
 0x429   : > { %v1242_v40 = vmul.f32 %v1235_v39, %v946_v38 }
 0x42a   : > { %v1512_v41 = vpop.f32.mrf.mxu1 }
 0x42b   : > { %1252 = vrot.lane.b32.xlu1 %v1242_v40, %s1767_s22 }
 0x495   : > { %v1245_v47 = vpop.permute.xlu0 %1244 }
 0x496   : > { %v1255_v50 = vsel %vm449_vm2, %v1239_v49, %v1245_v47 }
 0x499   : > { %v1249_v48 = vpop.permute.xlu1 %1248 }
 0x49a   : > { %v1257_v51 = vsel %vm1256_vm3, %v1255_v50, %v1249_v48 }
 0x49d   : > { %v1253_v52 = vpop.permute.xlu1 %1252 }
 0x49e   : > { %v1259_v53 = vsel %vm1258_vm4, %v1257_v51, %v1253_v52 }
 0x49f   : > { %1260 = vst.msk [vmem:[%s252_s25] sm:$0xff] %vm290_vm1, %v1259_v53 }
 0x4a0   : > { %1681 = shalt.err (!%p1678_p7)
}
 0x4a1   : > { %s1682_s24 = scalar_lea.hbm %s2033_s6, 128  ;;  %s1686_s14 = scalar_lea.hbm %s2080_s4, 256 }
 0x4a2   : > { %p1683_p6 = scmp.ne.s32.totalorder %s2033_s6, %s1682_s24  ;;  %p1687_p11 = scmp.lt.s32.totalorder %s2033_s6, %s2080_s4 }
 0x4a3   : > { %p1688_p12 = scmp.lt.s32.totalorder %s1686_s14, %s1682_s24 }
 0x4a4   : > { %p1684_p4 = pnand %p1683_p6, %p1881_p13 }
 0x4a5   : > { %p1689_p1 = por %p1688_p12, %p1687_p11 }
 0x4a6   : > { %p1685_p9 = pneg %p1684_p4 }
 0x4a8   : > { %p1690_p8 = pnand %p1689_p1, %p1685_p9 }
 0x4aa   : > { %1693 = shalt.err (!%p1690_p8)
}
 0x4ab   : > { %1519 = dma.vmem_to_hbm [thread:$0]  (%p1881_p13), %s1277_s23, 128, %s2033_s6, %s1262_s7  }
 0x4ac PF: > { %s1288_s22 = sand.u32 1, %s1732_s15   ;;  %p2094_p10 = scmp.ne.s32.totalorder %s2086_s26, 0 }
 0x4ad   : > { %p2095_p0 = scmp.ge.s32.totalorder %s1752_s20, 2  ;;  %s1289_s1 = scalar_lea.sflag [#allocation6], %s1288_s22 }
 0x4af   : > { %p1530_p2 = pnand %p2095_p0, %p2094_p10 }
 0x4b1   : > { %p1531_p3 = pneg %p1530_p2 }
 0x4b3   : > { %1727 = dma.done.wait (%p1531_p3), %s1289_s1, 128  }
 0x4b4   : > { %1729 = vsyncadd (%p1531_p3), %s1289_s1, 4294967168  ;;  %s21_s20 = sadd.s32 1, %s1752_s20   ;;  %s2096_s15 = smov %s1736_s16 }
 0x4b5   : > { %p18_p5 = scmp.ge.s32.totalorder %s21_s20, 4   ;;  %s2097_s16 = smov %s1740_s17 }
 0x4b6   : > { %s2098_s17 = smov %s1890_s28  ;;  %s2099_s18 = smov %s1748_s19 }
 0x4b7   : > { %s2100_s19 = smov %s2102_s5  ;;  %20 = sbr.rel (!%p18_p5) target bundleno = 9 (0x9), region = 99 }
 0x4bc   :  { %1294 = vsyncpa [#allocation5], 1 }
 0x4bd   :  { %1296 = vsyncpa [#allocation5 + $0x1], 1 }
 0x4be   :  { %1297 = vsyncpa [#allocation8], 1 }
 0x4bf   :  { %1298 = vsyncpa [#allocation6], 1 }
 0x4c0   :  { %1300 = vsyncpa [#allocation6 + $0x1], 1 }

// kernel: tpu_custom_call.1
= control target key start
LH: loop header
LB: loop body
LE: loop exit
PB: predicated region body
PF: predicated region fallthrough
CT: control target
= control target key end

     0   :  { %s2076_s0 = inlined_call_operand.hbm [shape: f32[2,8,32], index: 0, kind: input, shape index: {}]   ;;  %s2077_s1 = inlined_call_operand.hbm [shape: f32[32,96], index: 1, kind: input, shape index: {}]   ;;  %s2078_s2 = inlined_call_operand.vmem [shape: f32[1,96], index: 2, kind: input, shape index: {}]   ;;  %s2079_s3 = inlined_call_operand.vmem [shape: f32[2,1,8], index: 3, kind: input, shape index: {}]   ;;  %s2080_s4 = inlined_call_operand.hbm [shape: f32[2,8,32], index: 4, kind: output, shape index: {}]  }
   0x1   :  { %2082 = sst [smem:[#allocation13_spill]] %s2077_s1 }
   0x2   :  { %9 = vsyncpa [#allocation5], 0 }
   0x3   :  { %11 = vsyncpa [#allocation5 + $0x1], 0 }
   0x4   :  { %12 = vsyncpa [#allocation8], 0 }
   0x5   :  { %13 = vsyncpa [#allocation6], 0 }
   0x6   :  { %15 = vsyncpa [#allocation6 + $0x1], 0  ;;  %s1794_s15 = smov 0   ;;  %s1796_s16 = smov 0  }
   0x7   :  { %s1798_s17 = smov 0   ;;  %s1800_s18 = smov 0  }
   0x8   :  { %s1802_s19 = smov 0   ;;  %s1804_s20 = smov 0  }
   0x9 LB: > { %s1376_s21 = sadd.s32 4294967295, %s1752_s20   ;;  %s1377_s22 = sadd.s32 4294967294, %s1752_s20   ;;  %s1752_s20 = sphi %s1804_s20, %s21_s20   ;;  %s1748_s19 = sphi %s1802_s19, %s2100_s19   ;;  %s1744_s18 = sphi %s1800_s18, %s2099_s18   ;;  %s1740_s17 = sphi %s1798_s17, %s2098_s17   ;;  %s1736_s16 = sphi %s1796_s16, %s2097_s16   ;;  %s1732_s15 = sphi %s1794_s15, %s2096_s15  }
   0xa   : > { %p53_p0 = scmp.ne.s32.totalorder %s1736_s16, %s1732_s15  ;;  %p1828_p1 = scmp.eq.s32.totalorder %s1376_s21, 0 }
   0xb   : > { %p1832_p2 = scmp.eq.s32.totalorder %s1376_s21, 1  ;;  %p153_p3 = scmp.eq.s32.totalorder %s1377_s22, 1 }
   0xc   : > { %p1838_p4 = por %p1828_p1, %p53_p0  ;;  %p1378_p5 = scmp.ge.s32.totalorder %s1752_s20, 1 }
   0xd   : > { %p1843_p6 = por %p153_p3, %p53_p0  ;;  %p160_p7 = scmp.lt.s32.totalorder %s1752_s20, 3 }
   0xe   : > { %s2085_s25 = scalar_select %p1838_p4, 1, 0 }
   0xf   : > { %s2086_s26 = scalar_select %p1843_p6, 1, 0 }
  0x10   : > { %p1848_p8 = pnand %p1378_p5, %p160_p7  ;;  %s1754_s28 = smov [#allocation7]  }
  0x11   : > { %s172_s29 = sshll.u32 %s1754_s28, 4  ;;  %s33_s5 = sadd.s32 1, %s1748_s19  ;;  %s173_s29 = int_to_ptr.vmem [resolvable:$true] %s172_s29 }
  0x12   : > { %p1521_p9 = pneg %p1848_p8  ;;  %s1625_s6 = scalar_lea.vmem %s173_s29, 512 }
  0x13   : > { %p1626_p13 = scmp.ne.s32.totalorder %s173_s29, %s1625_s6  ;;  %p1633_p5 = scmp.lt.s32.totalorder %s173_s29, %s173_s29 }
  0x14   : > { %p1857_p11 = pnand %p1521_p9, %p1828_p1  ;;  %p1634_p7 = scmp.lt.s32.totalorder %s1625_s6, %s1625_s6 }
  0x16   : > { %p1616_p12 = pneg %p1857_p11  ;;  %p1635_p6 = por %p1634_p7, %p1633_p5 }
  0x18   : > { %p1628_p0 = pnand %p1626_p13, %p1616_p12 }
  0x1a   : > { %p1629_p3 = pneg %p1628_p0 }
  0x1c   : > { %p1636_p4 = pnand %p1635_p6, %p1629_p3 }
  0x1e   : > { %1639 = shalt.err (!%p1636_p4)
}
  0x1f   : > { %s1755_s7 = smov 128   ;;  %s1756_s8 = smov 8  }
  0x20   : > { %s2089_s1 = sld [smem:[#allocation13_spill]]  ;;  %p35_p6 = scmp.ge.s32.totalorder %s33_s5, 2 }
  0x21   : > { %s40_s11 = sadd.s32 1, %s1740_s17  ;;  %p47_p4 = scmp.ne.s32.totalorder %s1740_s17, %s1736_s16 }
  0x22   : > { %p48_p9 = scmp.eq.s32.totalorder %s1752_s20, 0  ;;  %s2102_s5 = smov (%p35_p6, %s33_s5), 0 }
  0x23   : > { %p1881_p13 = por %p1832_p2, %p47_p4  ;;  %s37_s14 = ssub.s32 %s1748_s19, %s2102_s5 }
  0x24   : > { %p1875_p12 = por %p48_p9, %p47_p4  ;;  %p1534_p0 = scmp.lt.s32.totalorder %s1752_s20, 2 }
  0x25   : > { %s189_s21 = sand.u32 1, %s1740_s17  }
  0x26   : > { %1524 = dma.hbm_to_vmem [thread:$0]  (!%p1857_p11), %s2089_s1, 512, %s173_s29, [#allocation8], %s1755_s7, %s1755_s7, %s1756_s8  }
  0x27   : > { %p38_p11 = scmp.eq.s32.totalorder %s37_s14, 0  ;;  %s1381_s22 = sshll.u32 %s189_s21, 3 }
  0x28   : > { %s1382_s29 = sshll.u32 %s1748_s19, 7  ;;  %s193_s8 = scalar_lea.vmem [#allocation4], %s1381_s22 }
  0x29   : > { %s1890_s28 = scalar_select %p38_p11, %s1740_s17, %s40_s11  }
  0x2a   : > { %s198_s7 = scalar_lea.hbm %s2076_s0, %s1382_s29  ;;  %s200_s9 = sshll.u32 %s193_s8, 4  ;;  %s201_s9 = int_to_ptr.vmem [resolvable:$true] %s200_s9 }
  0x2b   : > { %p1898_p2 = pnand %p1534_p0, %p1875_p12  ;;  %s190_s10 = scalar_lea.sflag [#allocation5], %s189_s21 }
  0x2c   : > { %s1653_s14 = scalar_lea.vmem %s201_s9, 128  ;;  %s1757_s11 = smov [#allocation4]  }
  0x2d   : > { %p1642_p3 = pneg %p1898_p2  ;;  %p1654_p5 = scmp.ne.s32.totalorder %s201_s9, %s1653_s14 }
  0x2e   : > { %s1658_s1 = sshll.u32 %s1757_s11, 4  ;;  %s1659_s1 = int_to_ptr.vmem [resolvable:$false] %s1658_s1 }
  0x2f   : > { %p1656_p7 = pnand %p1654_p5, %p1642_p3  ;;  %s1660_s29 = scalar_lea.vmem %s1659_s1, 256 }
  0x30   : > { %p1661_p4 = scmp.lt.s32.totalorder %s201_s9, %s1659_s1  ;;  %p1662_p9 = scmp.lt.s32.totalorder %s1660_s29, %s1653_s14 }
  0x31   : > { %p1657_p6 = pneg %p1656_p7 }
  0x32   : > { %p1663_p11 = por %p1662_p9, %p1661_p4 }
  0x34   : > { %p1664_p10 = pnand %p1663_p11, %p1657_p6 }
  0x36   : > { %1667 = shalt.err (!%p1664_p10)
}
  0x37   : > { %1528 = dma.hbm_to_vmem [thread:$0]  (!%p1898_p2), %s198_s7, 128, %s201_s9, %s190_s10  }
  0x38   : > { %215 = sbr.rel (%p1848_p8) target bundleno = 1196 (0x4ac), region = 36  ;;  %s1909_s12 = sand.u32 (!%p1848_p8), 1, %s1736_s16  }
  0x39   : > { %s1384_s21 = sshll.u32 (!%p1848_p8), %s1909_s12, 3  ;;  %s218_s22 = scalar_lea.sflag (!%p1848_p8), [#allocation5], %s1909_s12 }
  0x3a   : > { %s1915_s1 = scalar_lea.vmem (!%p1848_p8), [#allocation4], %s1384_s21  ;;  %p2093_p12 = scmp.ne.s32.totalorder (!%p1848_p8), %s2085_s25, 0 }
  0x3d   : > { %1719 = dma.done.wait (%p2093_p12), %s218_s22, 128  }
  0x3e   : > { %1721 = vsyncadd (%p2093_p12), %s218_s22, 4294967168 }
  0x3f   : > { %1723 = dma.done.wait (%p1828_p1), [#allocation8], 512  }
  0x40   : > { %1725 = vsyncadd (%p1828_p1), [#allocation8], 4294966784  ;;  %v1758_v0 = vmov 0.0   ;;  %vm1759_vm0 = vmmov 0   ;;  %v264_v1 = vld [vmem:[#allocation7 + $0x18] sm:$0xff]  ;;  %v262_v2 = vld [vmem:[#allocation7 + $0x8] sm:$0xff] }
  0x41   : > { %1440 = vmatprep.subr.mxu0 %v1758_v0  ;;  %1451 = vmatprep.subr.mxu1 %v1758_v0  ;;  %s1760_s25 = smov 96   ;;  %v263_v3 = vld [vmem:[#allocation7 + $0x10] sm:$0xff]  ;;  %v261_v4 = vld [vmem:[#allocation7] sm:$0xff]  ;;  %s1761_s30 = smov 64   ;;  %vm290_vm1 = vcmask 261120   ;;  %vm449_vm2 = vcmask 64512  }
  0x42   : > { %1448 = vmatprep.mubr.msk.f32.mxu0 %vm1759_vm0, %v1758_v0  ;;  %1459 = vmatprep.mubr.msk.f32.mxu1 %vm1759_vm0, %v1758_v0  ;;  %v1934_v5 = vld [vmem:[%s2078_s2] ss:$0 sm:$0xff]  ;;  %s1762_s6 = smov 104   ;;  %s1763_s7 = smov 120   ;;  %vm1256_vm3 = vcmask 130048   ;;  %vm1258_vm4 = vcmask 195584  }
  0x43   : > { %281 = vrot.lane.b32.xlu0 %v264_v1, %s1760_s25  ;;  %277 = vrot.lane.b32.xlu1 %v262_v2, %s1760_s25  ;;  %v260_v10 = vld [vmem:[%s1915_s1] sm:$0xff]  ;;  %s1764_s8 = smov 112   ;;  %p253_p1 = scmp.lt.s32.totalorder %s1744_s18, 1 }
  0x44   : > { %s1765_s11 = smov 8   ;;  %s1766_s29 = smov 16  }
  0x45   : > { %s254_s9 = scalar_select %p253_p1, %s1744_s18, 1 }
  0x46   : > { %s1767_s22 = smov 24   ;;  %s1406_s1 = sshll.u32 %s1744_s18, 7 }
  0x47   : > { %279 = vrot.lane.b32.xlu0 %v263_v3, %s1760_s25  ;;  %275 = vrot.lane.b32.xlu1 %v261_v4, %s1760_s25  ;;  %s255_s14 = scalar_lea.vmem %s2079_s3, %s254_s9  ;;  %s1768_s18 = smov [#allocation9]  }
  0x48   : > { %v1392_v37 = vld [vmem:[%s255_s14] ss:$0 sm:$0xff] }
  0x4b   : > { %287 = vrot.lane.b32.xlu0 %v1934_v5, %s1760_s25  ;;  %370 = vrot.lane.b32.xlu1 %v264_v1, %s1761_s30  ;;  %s252_s25 = scalar_lea.vmem [#allocation9], %s1384_s21  ;;  %s1672_s21 = sshll.u32 %s1768_s18, 4  ;;  %s1673_s21 = int_to_ptr.vmem [resolvable:$false] %s1672_s21 }
  0x4c   : > { %s1276_s23 = sshll.u32 %s252_s25, 4  ;;  %s1674_s9 = scalar_lea.vmem %s1673_s21, 256  ;;  %s1277_s23 = int_to_ptr.vmem [resolvable:$true] %s1276_s23 }
  0x4d   : > { %p1675_p2 = scmp.lt.s32.totalorder %s1277_s23, %s1673_s21 }
  0x4f   : > { %368 = vrot.lane.b32.xlu0 %v263_v3, %s1761_s30  ;;  %366 = vrot.lane.b32.xlu1 %v262_v2, %s1761_s30 }
  0x53   : > { %364 = vrot.lane.b32.xlu1 %v261_v4, %s1761_s30 }
  0xb5   : > { %v282_v6 = vpop.permute.xlu0 %281  ;;  %v278_v7 = vpop.permute.xlu1 %277 }
  0xb6   : > { %1441 = vmatpush3.msra.mxu0 %v282_v6 }
  0xb7   : > { %1442 = vmatprep.subr.mxu0 %v1758_v0 }
  0xb9   : > { %v280_v8 = vpop.permute.xlu0 %279  ;;  %v276_v9 = vpop.permute.xlu1 %275 }
  0xba   : > { %1443 = vmatpush3.msra.mxu0 %v280_v8 }
  0xbb   : > { %1444 = vmatprep.subr.mxu0 %v1758_v0 }
  0xbc   : > { %1445 = vmatpush3.msra.mxu0 %v278_v7 }
  0xbd   : > { %1446 = vmatprep.subr.mxu0 %v1758_v0  ;;  %v371_v11 = vpop.permute.xlu1 %370  ;;  %v288_v12 = vpop.permute.xlu0 %287 }
  0xbe   : > { %1447 = vmatpush3.msra.mxu0 %v276_v9  ;;  %1452 = vmatpush3.msra.mxu1 %v371_v11 }
  0xbf   : > { %1449 = vmatmul.mubr.msk.f32.vlgmr.msra.gmra.mxu0 %vm290_vm1, %v260_v10  ;;  %1462 = vmatprep.subr.mxu0 %v1758_v0 }
  0xc0   : > { %1463 = vmatpush3.msra.mxu0 %v264_v1  ;;  %1470 = vmatprep.mubr.msk.f32.mxu0 %vm1759_vm0, %v1758_v0 }
  0xc1   : > { %1464 = vmatprep.subr.mxu0 %v1758_v0  ;;  %1453 = vmatprep.subr.mxu1 %v1758_v0  ;;  %v369_v13 = vpop.permute.xlu0 %368  ;;  %v367_v14 = vpop.permute.xlu1 %366 }
  0xc2   : > { %1465 = vmatpush3.msra.mxu0 %v263_v3  ;;  %1454 = vmatpush3.msra.mxu1 %v369_v13 }
  0xc3   : > { %1466 = vmatprep.subr.mxu0 %v1758_v0  ;;  %1455 = vmatprep.subr.mxu1 %v1758_v0 }
  0xc4   : > { %1467 = vmatpush3.msra.mxu0 %v262_v2  ;;  %1456 = vmatpush3.msra.mxu1 %v367_v14 }
  0xc5   : > { %1468 = vmatprep.subr.mxu0 %v1758_v0  ;;  %1457 = vmatprep.subr.mxu1 %v1758_v0  ;;  %v365_v15 = vpop.permute.xlu1 %364 }
  0xc6   : > { %1469 = vmatpush3.msra.mxu0 %v261_v4  ;;  %1458 = vmatpush3.msra.mxu1 %v365_v15 }
  0xc7   : > { %1471 = vmatmul.mubr.msk.f32.vlgmr.msra.gmra.mxu0 %vm290_vm1, %v260_v10  ;;  %1483 = vmatprep.subr.mxu0 %v1758_v0 }
  0xc8   : > { %1485 = vmatprep.mubr.msk.f32.mxu0 %vm1759_vm0, %v1758_v0  ;;  %1460 = vmatmul.mubr.msk.f32.vlgmr.msra.gmra.mxu1 %vm290_vm1, %v260_v10 }
  0xc9   : > { %1473 = vmatprep.subr.mxu1 %v1758_v0  ;;  %1475 = vmatprep.mubr.msk.f32.mxu1 %vm1759_vm0, %v1758_v0 }
 0x17f   : > { %v360_v16 = vpop.f32.mrf.mxu0 }
 0x180   : > { %v361_v17 = vadd.f32 %v360_v16, %v288_v12 }
 0x181   : > { %v1450_v18 = vpop.f32.mrf.mxu0 }
 0x182   : > { %450 = vst.msk [vmem:[#allocation2] sm:$0xff] %vm449_vm2, %v361_v17  ;;  %474 = vrot.lane.b32.xlu1 %v361_v17, %s1762_s6  ;;  %453 = vrot.lane.b32.xlu0 %v361_v17, %s1763_s7 }
 0x186   : > { %464 = vrot.lane.b32.xlu0 %v361_v17, %s1764_s8 }
 0x187   : > { %v568_v19 = vpop.f32.mrf.mxu0 }
 0x188   : > { %v569_v20 = vadd.f32 %v1934_v5, %v568_v19  ;;  %v445_v23 = vpop.f32.mrf.mxu1 }
 0x189   : > { %v579_v21 = vld [vmem:[#allocation2] sm:$0xff]  ;;  %v1472_v22 = vpop.f32.mrf.mxu0 }
 0x18a   : > { %1474 = vmatpush3.xpose.msk.msra.mxu1 %vm449_vm2, %v579_v21  ;;  %573 = vrot.lane.b32.xlu0 %v569_v20, %s1763_s7  ;;  %v1461_v24 = vpop.f32.mrf.mxu1 }
 0x18b   : > { %575 = vrot.lane.b32.xlu1 %v569_v20, %s1764_s8  ;;  %1478 = vmatprep.subr.mxu1 %v1758_v0 }
 0x18d   : > { %1476 = vmatmul.mubr.msk.f32.vlgmr.msra.gmra.mxu1 %vm449_vm2, %v569_v20 }
 0x18e   : > { %577 = vrot.lane.b32.xlu0 %v569_v20, %s1762_s6  ;;  %1480 = vmatprep.mubr.msk.f32.mxu1 %vm1759_vm0, %v1758_v0 }
 0x18f   : > { %376 = vrot.lane.b32.xlu1 %v1934_v5, %s1761_s30 }
 0x1f4   : > { %v475_v25 = vpop.permute.xlu1 %474  ;;  %v454_v26 = vpop.permute.xlu0 %453 }
 0x1f5   : > { %478 = vst.msk [vmem:[#allocation2 + $0x18] sm:$0xff] %vm449_vm2, %v475_v25  ;;  %457 = vst.msk [vmem:[#allocation2 + $0x8] sm:$0xff] %vm449_vm2, %v454_v26 }
 0x1f8   : > { %v465_v27 = vpop.permute.xlu0 %464 }
 0x1f9   : > { %468 = vst.msk [vmem:[#allocation2 + $0x10] sm:$0xff] %vm449_vm2, %v465_v27 }
 0x1fc   : > { %v580_v28 = vld [vmem:[#allocation2 + $0x8] sm:$0xff]  ;;  %v574_v29 = vpop.permute.xlu0 %573  ;;  %v582_v32 = vld [vmem:[#allocation2 + $0x18] sm:$0xff] }
 0x1fd   : > { %1479 = vmatpush3.xpose.msk.msra.mxu1 %vm449_vm2, %v580_v28  ;;  %v576_v30 = vpop.permute.xlu1 %575 }
 0x1fe   : > { %1488 = vmatprep.subr.mxu1 %v1758_v0 }
 0x200   : > { %1481 = vmatmul.mubr.msk.f32.vlgmr.msra.gmra.mxu1 %vm449_vm2, %v574_v29  ;;  %v581_v31 = vld [vmem:[#allocation2 + $0x10] sm:$0xff]  ;;  %v578_v33 = vpop.permute.xlu0 %577 }
 0x201   : > { %1484 = vmatpush3.xpose.msk.msra.mxu0 %vm449_vm2, %v581_v31  ;;  %1489 = vmatpush3.xpose.msk.msra.mxu1 %vm449_vm2, %v582_v32  ;;  %v377_v34 = vpop.permute.xlu1 %376 }
 0x202   : > { %1490 = vmatprep.mubr.msk.f32.mxu1 %vm1759_vm0, %v1758_v0  ;;  %v446_v35 = vadd.f32 %v445_v23, %v377_v34  ;;  %1493 = vmatprep.subr.mxu0 %v1758_v0 }
 0x203   : > { %1498 = vmatprep.subr.mxu1 %v1758_v0 }
 0x204   : > { %1486 = vmatmul.mubr.msk.f32.vlgmr.msra.gmra.mxu0 %vm449_vm2, %v576_v30  ;;  %1491 = vmatmul.mubr.msk.f32.vlgmr.msra.gmra.mxu1 %vm449_vm2, %v578_v33  ;;  %451 = vst.msk [vmem:[#allocation3] sm:$0xff] %vm449_vm2, %v446_v35 }
 0x205   : > { %459 = vrot.lane.b32.xlu1 %v446_v35, %s1763_s7  ;;  %1495 = vmatprep.mubr.msk.f32.mxu0 %vm1759_vm0, %v1758_v0  ;;  %s1262_s7 = scalar_lea.sflag [#allocation6], %s1909_s12 }
 0x206   : > { %1500 = vmatprep.mubr.msk.f32.mxu1 %vm1759_vm0, %v1758_v0 }
 0x20b   : > { %v583_v36 = vld [vmem:[#allocation3] sm:$0xff] }
 0x20c   : > { %1494 = vmatpush3.msra.mxu0 %v583_v36 }
 0x20d   : > { %1503 = vmatprep.subr.mxu0 %v1758_v0 }
 0x24d   : > { %v666_v38 = vpop.f32.mrf.mxu1 }
 0x24e   : > { %v667_v39 = vadd.f32 %v1392_v37, %v666_v38 }
 0x24f   : > { %v1477_v40 = vpop.f32.mrf.mxu1 }
 0x250   : > { %v895_v41 = vsel %vm449_vm2, %v667_v39, -inf }
 0x251   : > { %896 = vmax.xlane.f32.xlu0 %v895_v41 }
 0x277   : > { %v460_v42 = vpop.permute.xlu1 %459 }
 0x278   : > { %463 = vst.msk [vmem:[#allocation3 + $0x8] sm:$0xff] %vm449_vm2, %v460_v42 }
 0x27f   : > { %v584_v43 = vld [vmem:[#allocation3 + $0x8] sm:$0xff] }
 0x280   : > { %1499 = vmatpush3.msra.mxu1 %v584_v43 }
 0x281   : > { %1508 = vmatprep.subr.mxu1 %v1758_v0 }
 0x2c0   : > { %v741_v44 = vpop.f32.mrf.mxu1 }
 0x2c1   : > { %v742_v45 = vadd.f32 %v1392_v37, %v741_v44 }
 0x2c2   : > { %v1482_v46 = vpop.f32.mrf.mxu1 }
 0x2c3   : > { %v898_v47 = vsel %vm449_vm2, %v742_v45, -inf }
 0x2c4   : > { %899 = vmax.xlane.f32.xlu1 %v898_v47  ;;  %v816_v48 = vpop.f32.mrf.mxu0  ;;  %v891_v49 = vpop.f32.mrf.mxu1 }
 0x2c5   : > { %v817_v50 = vadd.f32 %v1392_v37, %v816_v48  ;;  %v892_v53 = vadd.f32 %v1392_v37, %v891_v49 }
 0x2c6   : > { %v1487_v51 = vpop.f32.mrf.mxu0  ;;  %v1492_v52 = vpop.f32.mrf.mxu1 }
 0x2c7   : > { %v901_v54 = vsel %vm449_vm2, %v817_v50, -inf  ;;  %v904_v55 = vsel %vm449_vm2, %v892_v53, -inf }
 0x2c8   : > { %902 = vmax.xlane.f32.xlu0 %v901_v54 }
 0x2cc   : > { %905 = vmax.xlane.f32.xlu0 %v904_v55 }
 0x2d5   : > { %479 = vrot.lane.b32.xlu1 %v446_v35, %s1762_s6  ;;  %s2033_s6 = scalar_lea.hbm %s2080_s4, %s1406_s1 }
 0x2da   : > { %v897_v56 = vpop.xlane.xlu0 %896 }
 0x2db   : > { %v907_v57 = vsub.f32 %v667_v39, %v897_v56 }
 0x2dd   : > { %v911_v58 = vmul.f32 1.442695, %v907_v57 }
 0x2df   : > { %1598 = vpow2.f32 %v911_v58 }
 0x2e2   : > { %469 = vrot.lane.b32.xlu0 %v446_v35, %s1764_s8  ;;  %s1668_s8 = scalar_lea.vmem %s1277_s23, 128 }
 0x2e3   : > { %p1669_p8 = scmp.ne.s32.totalorder %s1277_s23, %s1668_s8  ;;  %p1676_p3 = scmp.lt.s32.totalorder %s1674_s9, %s1668_s8 }
 0x2e5   : > { %p1670_p10 = pnand %p1669_p8, %p1881_p13  ;;  %p1677_p5 = por %p1676_p3, %p1675_p2 }
 0x2e7   : > { %p1671_p0 = pneg %p1670_p10 }
 0x2e9   : > { %p1678_p7 = pnand %p1677_p5, %p1671_p0 }
 0x2ec   : > { %v1599_v59 = vpop.eup %1598 }
 0x2ed   : > { %1496 = vmatmul.mubr.msk.f32.vlgmr.msra.gmra.mxu0 %vm449_vm2, %v1599_v59  ;;  %v919_v13 = vsel %vm449_vm2, %v1599_v59, 0.0 }
 0x2ee   : > { %1505 = vmatprep.mubr.msk.f32.mxu0 %vm1759_vm0, %v1758_v0 }
 0x34d   : > { %v900_v60 = vpop.xlane.xlu1 %899 }
 0x34e   : > { %v908_v61 = vsub.f32 %v742_v45, %v900_v60 }
 0x350   : > { %v913_v62 = vmul.f32 1.442695, %v908_v61 }
 0x351   : > { %v480_v63 = vpop.permute.xlu1 %479  ;;  %v903_v1 = vpop.xlane.xlu0 %902 }
 0x352   : > { %1600 = vpow2.f32 %v913_v62  ;;  %483 = vst.msk [vmem:[#allocation3 + $0x18] sm:$0xff] %vm449_vm2, %v480_v63  ;;  %v909_v2 = vsub.f32 %v817_v50, %v903_v1 }
 0x354   : > { %v915_v3 = vmul.f32 1.442695, %v909_v2 }
 0x355   : > { %v906_v4 = vpop.xlane.xlu0 %905 }
 0x356   : > { %1602 = vpow2.f32 %v915_v3  ;;  %v910_v5 = vsub.f32 %v892_v53, %v906_v4 }
 0x358   : > { %v917_v6 = vmul.f32 1.442695, %v910_v5 }
 0x359   : > { %v470_v7 = vpop.permute.xlu0 %469  ;;  %v586_v9 = vld [vmem:[#allocation3 + $0x18] sm:$0xff] }
 0x35a   : > { %1604 = vpow2.f32 %v917_v6  ;;  %473 = vst.msk [vmem:[#allocation3 + $0x10] sm:$0xff] %vm449_vm2, %v470_v7 }
 0x35f   : > { %v1601_v8 = vpop.eup %1600 }
 0x360   : > { %1501 = vmatmul.mubr.msk.f32.vlgmr.msra.gmra.mxu1 %vm449_vm2, %v1601_v8  ;;  %v922_v10 = vsel %vm449_vm2, %v1601_v8, 0.0 }
 0x361   : > { %1509 = vmatpush3.msra.mxu1 %v586_v9  ;;  %923 = vadd.xlane.f32.xlu1 %v922_v10  ;;  %v585_v11 = vld [vmem:[#allocation3 + $0x10] sm:$0xff] }
 0x362   : > { %1504 = vmatpush3.msra.mxu0 %v585_v11  ;;  %1510 = vmatprep.mubr.msk.f32.mxu1 %vm1759_vm0, %v1758_v0 }
 0x363   : > { %v1603_v12 = vpop.eup %1602 }
 0x364   : > { %1506 = vmatmul.mubr.msk.f32.vlgmr.msra.gmra.mxu0 %vm449_vm2, %v1603_v12  ;;  %v925_v14 = vsel %vm449_vm2, %v1603_v12, 0.0 }
 0x365   : > { %920 = vadd.xlane.f32.xlu1 %v919_v13  ;;  %926 = vadd.xlane.f32.xlu0 %v925_v14 }
 0x367   : > { %v1605_v15 = vpop.eup %1604 }
 0x368   : > { %1511 = vmatmul.mubr.msk.f32.vlgmr.msra.gmra.mxu1 %vm449_vm2, %v1605_v15  ;;  %v928_v16 = vsel %vm449_vm2, %v1605_v15, 0.0 }
 0x369   : > { %929 = vadd.xlane.f32.xlu0 %v928_v16 }
 0x3ad   : > { %v1016_v17 = vpop.f32.mrf.mxu0 }
 0x3af   : > { %v1497_v18 = vpop.f32.mrf.mxu0 }
 0x3ea   : > { %v924_v19 = vpop.xlane.xlu1 %923 }
 0x3eb   : > { %1606 = vrcp.f32 %v924_v19 }
 0x3ee   : > { %v927_v20 = vpop.xlane.xlu0 %926  ;;  %v921_v42 = vpop.xlane.xlu1 %920 }
 0x3ef   : > { %1608 = vrcp.f32 %v927_v20 }
 0x3f2   : > { %v930_v0 = vpop.xlane.xlu0 %929 }
 0x3f3   : > { %1610 = vrcp.f32 %v930_v0 }
 0x3f4   : > { %1612 = vrcp.f32 %v921_v42 }
 0x3f8   : > { %v1607_v21 = vpop.eup %1606 }
 0x3f9   : > { %v936_v22 = vmul.f32 %v1607_v21, %v924_v19 }
 0x3fb   : > { %v940_v24 = vsub.f32 2.0, %v936_v22 }
 0x3fc   : > { %v1609_v23 = vpop.eup %1608 }
 0x3fd   : > { %v937_v25 = vmul.f32 %v1609_v23, %v927_v20  ;;  %v944_v29 = vmul.f32 %v1607_v21, %v940_v24 }
 0x3ff   : > { %v941_v27 = vsub.f32 2.0, %v937_v25 }
 0x400   : > { %v1611_v26 = vpop.eup %1610 }
 0x401   : > { %v938_v28 = vmul.f32 %v1611_v26, %v930_v0  ;;  %v945_v34 = vmul.f32 %v1609_v23, %v941_v27  ;;  %v1613_v43 = vpop.eup %1612 }
 0x402   : > { %v935_v44 = vmul.f32 %v1613_v43, %v921_v42 }
 0x403   : > { %v942_v33 = vsub.f32 2.0, %v938_v28 }
 0x404   : > { %v939_v45 = vsub.f32 2.0, %v935_v44 }
 0x405   : > { %v946_v38 = vmul.f32 %v1611_v26, %v942_v33 }
 0x406   : > { %v943_v46 = vmul.f32 %v1613_v43, %v939_v45 }
 0x408   : > { %v1239_v49 = vmul.f32 %v1016_v17, %v943_v46 }
 0x420   : > { %v1089_v30 = vpop.f32.mrf.mxu1 }
 0x421   : > { %v1240_v31 = vmul.f32 %v1089_v30, %v944_v29 }
 0x422   : > { %v1502_v32 = vpop.f32.mrf.mxu1 }
 0x423   : > { %1244 = vrot.lane.b32.xlu0 %v1240_v31, %s1765_s11 }
 0x424   : > { %v1162_v35 = vpop.f32.mrf.mxu0 }
 0x425   : > { %v1241_v36 = vmul.f32 %v1162_v35, %v945_v34 }
 0x426   : > { %v1507_v37 = vpop.f32.mrf.mxu0 }
 0x427   : > { %1248 = vrot.lane.b32.xlu1 %v1241_v36, %s1766_s29 }
 0x428   : > { %v1235_v39 = vpop.f32.mrf.mxu1 }
 0x429   : > { %v1242_v40 = vmul.f32 %v1235_v39, %v946_v38 }
 0x42a   : > { %v1512_v41 = vpop.f32.mrf.mxu1 }
 0x42b   : > { %1252 = vrot.lane.b32.xlu1 %v1242_v40, %s1767_s22 }
 0x495   : > { %v1245_v47 = vpop.permute.xlu0 %1244 }
 0x496   : > { %v1255_v50 = vsel %vm449_vm2, %v1239_v49, %v1245_v47 }
 0x499   : > { %v1249_v48 = vpop.permute.xlu1 %1248 }
 0x49a   : > { %v1257_v51 = vsel %vm1256_vm3, %v1255_v50, %v1249_v48 }
 0x49d   : > { %v1253_v52 = vpop.permute.xlu1 %1252 }
 0x49e   : > { %v1259_v53 = vsel %vm1258_vm4, %v1257_v51, %v1253_v52 }
 0x49f   : > { %1260 = vst.msk [vmem:[%s252_s25] sm:$0xff] %vm290_vm1, %v1259_v53 }
 0x4a0   : > { %1681 = shalt.err (!%p1678_p7)
}
 0x4a1   : > { %s1682_s24 = scalar_lea.hbm %s2033_s6, 128  ;;  %s1686_s14 = scalar_lea.hbm %s2080_s4, 256 }
 0x4a2   : > { %p1683_p6 = scmp.ne.s32.totalorder %s2033_s6, %s1682_s24  ;;  %p1687_p11 = scmp.lt.s32.totalorder %s2033_s6, %s2080_s4 }
 0x4a3   : > { %p1688_p12 = scmp.lt.s32.totalorder %s1686_s14, %s1682_s24 }
 0x4a4   : > { %p1684_p4 = pnand %p1683_p6, %p1881_p13 }
 0x4a5   : > { %p1689_p1 = por %p1688_p12, %p1687_p11 }
 0x4a6   : > { %p1685_p9 = pneg %p1684_p4 }
 0x4a8   : > { %p1690_p8 = pnand %p1689_p1, %p1685_p9 }
 0x4aa   : > { %1693 = shalt.err (!%p1690_p8)
}
 0x4ab   : > { %1519 = dma.vmem_to_hbm [thread:$0]  (%p1881_p13), %s1277_s23, 128, %s2033_s6, %s1262_s7  }
 0x4ac PF: > { %s1288_s22 = sand.u32 1, %s1732_s15   ;;  %p2094_p10 = scmp.ne.s32.totalorder %s2086_s26, 0 }
 0x4ad   : > { %p2095_p0 = scmp.ge.s32.totalorder %s1752_s20, 2  ;;  %s1289_s1 = scalar_lea.sflag [#allocation6], %s1288_s22 }
 0x4af   : > { %p1530_p2 = pnand %p2095_p0, %p2094_p10 }
 0x4b1   : > { %p1531_p3 = pneg %p1530_p2 }
 0x4b3   : > { %1727 = dma.done.wait (%p1531_p3), %s1289_s1, 128  }
 0x4b4   : > { %1729 = vsyncadd (%p1531_p3), %s1289_s1, 4294967168  ;;  %s21_s20 = sadd.s32 1, %s1752_s20   ;;  %s2096_s15 = smov %s1736_s16 }
 0x4b5   : > { %p18_p5 = scmp.ge.s32.totalorder %s21_s20, 4   ;;  %s2097_s16 = smov %s1740_s17 }
 0x4b6   : > { %s2098_s17 = smov %s1890_s28  ;;  %s2099_s18 = smov %s1748_s19 }
 0x4b7   : > { %s2100_s19 = smov %s2102_s5  ;;  %20 = sbr.rel (!%p18_p5) target bundleno = 9 (0x9), region = 99 }
 0x4bc   :  { %1294 = vsyncpa [#allocation5], 1 }
 0x4bd   :  { %1296 = vsyncpa [#allocation5 + $0x1], 1 }
 0x4be   :  { %1297 = vsyncpa [#allocation8], 1 }
 0x4bf   :  { %1298 = vsyncpa [#allocation6], 1 }
 0x4c0   :  { %1300 = vsyncpa [#allocation6 + $0x1], 1 }

</bundles_post_ra>
